<compile_context>
chip_gen: v7x
topology: tpu7x:2x2x1
jax: 0.10.0
libtpu: 0.0.40
codegen_flags: <defaults>
</compile_context>

<pallas_src>
import functools
import math

import jax
import jax.numpy as jnp
from jax.experimental import pallas as pl
from jax.experimental.pallas import tpu as pltpu

LEAK = 0.1
BN_EPS = 1e-5


def _lrelu(v):
    return jnp.where(v >= 0, v, LEAK * v)


# ---------------------------------------------------------------------------
# Kernel 1: fused conv-as-matmul + BatchNorm1d (train-mode stats) + LeakyReLU
#           for ALL filter windows, writing one lane-dense (B*L, d_sum) slab.
# ---------------------------------------------------------------------------
def make_conv_bn_lrelu_kernel(n_windows, feat_dims):
    def kernel(*refs):
        o_ref = refs[-1]
        col = 0
        for k in range(n_windows):
            xw_ref, w_ref, b_ref, g_ref, beta_ref = refs[5 * k: 5 * k + 5]
            # bf16 MXU inputs, f32 accumulation; BN / LeakyReLU stay in f32 (VPU).
            y = jnp.dot(xw_ref[...], w_ref[...],
                        preferred_element_type=jnp.float32) + b_ref[...]
            mu = jnp.mean(y, axis=0, keepdims=True)
            var = jnp.mean((y - mu) ** 2, axis=0, keepdims=True)  # biased var (torch BN train)
            yn = (y - mu) * jax.lax.rsqrt(var + BN_EPS) * g_ref[...] + beta_ref[...]
            f = feat_dims[k]
            o_ref[:, col:col + f] = _lrelu(yn).astype(o_ref.dtype)
            col += f
    return kernel


def conv_bn_lrelu_fused(xw_list, conv_w, conv_b, bn_g, bn_b):
    # BN batch statistics need all B*L rows at once -> whole-slab grid=(1,).
    # TODO(synk): for large B*L, re-tile rows with a two-pass (partial sum/sumsq)
    # reduction so the stats stay exact while restoring DMA/compute overlap.
    R = xw_list[0].shape[0]
    feat_dims = tuple(w.shape[1] for w in conv_w)
    d_sum = sum(feat_dims)

    full = lambda shape: pl.BlockSpec(shape, lambda i: (0, 0))
    operands, in_specs = [], []
    for xw, w, b, g, beta in zip(xw_list, conv_w, conv_b, bn_g, bn_b):
        K, F = w.shape
        operands += [xw, w.astype(jnp.bfloat16), b, g, beta]
        in_specs += [full((R, K)), full((K, F)), full((1, F)), full((1, F)), full((1, F))]

    return pl.pallas_call(
        make_conv_bn_lrelu_kernel(len(xw_list), feat_dims),
        out_shape=jax.ShapeDtypeStruct((R, d_sum), jnp.bfloat16),
        grid=(1,),
        in_specs=in_specs,
        out_specs=full((R, d_sum)),
        compiler_params=pltpu.CompilerParams(
            dimension_semantics=("arbitrary",),
            vmem_limit_bytes=32 * 1024 * 1024),
    )(*operands)


# ---------------------------------------------------------------------------
# Kernel 2: pairwise relation MLP (batched over all (i, j) pairs) + mean over j
#           + final MLP layer.
#   out[b, i, :] = MLP2( mean_j MLP4( concat(feat[b,i], feat[b,j]) ) )
# ---------------------------------------------------------------------------
def make_relation_kernel(ti, lj, n_i_blocks, n_j_chunks):
    def kernel(feat_ref,
               w1a_ref, w1b_ref, b1_ref,
               w2_ref, b2_ref, w3_ref, b3_ref, w4_ref, b4_ref,
               w5_ref, b5_ref, w6_ref, b6_ref,
               out_ref):
        L = feat_ref.shape[0]
        d_mlp = w2_ref.shape[0]
        bf16 = jnp.bfloat16

        # i-rows are a slice of the already-resident (L, S) feat block (no extra input).
        if n_i_blocks == 1:
            feat_i = feat_ref[...]                               # (ti, S) bf16
        else:
            i0 = pl.multiple_of(pl.program_id(1) * ti, ti)
            feat_i = feat_ref[pl.ds(i0, ti), :]

        # First pair-MLP linear, split over the concat: q_i + p_j (+ b1).
        q = jnp.dot(feat_i, w1a_ref[...], preferred_element_type=jnp.float32)  # (ti, d_mlp)
        qb = q + b1_ref[...]                                     # hoist bias add out of the loop

        acc = jnp.zeros((ti, d_mlp), jnp.float32)
        for c in range(n_j_chunks):                              # static j-chunk loop (1 chunk here)
            feat_j = feat_ref[c * lj:(c + 1) * lj, :]            # (lj, S) bf16
            p = jnp.dot(feat_j, w1b_ref[...], preferred_element_type=jnp.float32)  # (lj, d_mlp)
            # Batch all (i, j) pairs of this chunk into one (ti*lj, d_mlp) slab so each
            # 128x128 matmul runs once with a large M instead of lj times with M=ti.
            h = _lrelu(qb[:, None, :] + p[None, :, :])           # (ti, lj, d_mlp) f32
            h = h.reshape(ti * lj, d_mlp)
            h = _lrelu(jnp.dot(h.astype(bf16), w2_ref[...],
                               preferred_element_type=jnp.float32) + b2_ref[...])
            h = _lrelu(jnp.dot(h.astype(bf16), w3_ref[...],
                               preferred_element_type=jnp.float32) + b3_ref[...])
            h = _lrelu(jnp.dot(h.astype(bf16), w4_ref[...],
                               preferred_element_type=jnp.float32) + b4_ref[...])
            acc = acc + h.reshape(ti, lj, d_mlp).sum(axis=1)     # f32 accumulation over j

        hm = acc * (1.0 / L)                                     # mean over j (exact, no padding)

        z = _lrelu(jnp.dot(hm.astype(bf16), w5_ref[...],
                           preferred_element_type=jnp.float32) + b5_ref[...])
        out = _lrelu(jnp.dot(z.astype(bf16), w6_ref[...],
                             preferred_element_type=jnp.float32) + b6_ref[...])
        out_ref[...] = out.astype(out_ref.dtype)
    return kernel


def relation_mlp(feat, p):
    B, L, S = feat.shape
    d_mlp = p["W2"].shape[0]
    d_out = p["W6"].shape[1]

    ti = min(L, 128)                  # big i-tile: keep the MXU M dimension large
    assert L % ti == 0, (L, ti)
    lj = L if L <= 512 else 512       # j-chunk bounds the (ti*lj, d_mlp) pair slab (v7x VMEM)
    assert L % lj == 0, (L, lj)

    bf16 = jnp.bfloat16
    wspec = lambda shape: pl.BlockSpec(shape, lambda b, i: (0, 0))

    return pl.pallas_call(
        make_relation_kernel(ti, lj, L // ti, L // lj),
        out_shape=jax.ShapeDtypeStruct((B, L, d_out), jnp.float32),
        grid=(B, L // ti),
        in_specs=[
            pl.BlockSpec((None, L, S), lambda b, i: (b, 0, 0)),   # whole sequence for batch b
            wspec((S, d_mlp)), wspec((S, d_mlp)), wspec((1, d_mlp)),
            wspec((d_mlp, d_mlp)), wspec((1, d_mlp)),
            wspec((d_mlp, d_mlp)), wspec((1, d_mlp)),
            wspec((d_mlp, d_mlp)), wspec((1, d_mlp)),
            wspec((d_mlp, d_mlp)), wspec((1, d_mlp)),
            wspec((d_mlp, d_out)), wspec((1, d_out)),
        ],
        out_specs=pl.BlockSpec((None, ti, d_out), lambda b, i: (b, i, 0)),
        compiler_params=pltpu.CompilerParams(
            dimension_semantics=("parallel", "parallel"),
            vmem_limit_bytes=32 * 1024 * 1024),
    )(feat,
      p["W1a"].astype(bf16), p["W1b"].astype(bf16), p["b1"],
      p["W2"].astype(bf16), p["b2"], p["W3"].astype(bf16), p["b3"],
      p["W4"].astype(bf16), p["b4"], p["W5"].astype(bf16), p["b5"],
      p["W6"].astype(bf16), p["b6"])


# ---------------------------------------------------------------------------
# Full forward (glue in plain JAX, hot paths in the Pallas kernels above)
# ---------------------------------------------------------------------------
def relation_layer_forward(x, p, fltr_windows):
    L, B, E = x.shape
    xb = jnp.transpose(x, (1, 0, 2))                               # (B, L, E)

    # Unfold (im2col) per window — plain-JAX glue feeding the fused conv kernel.
    # TODO(synk): for large L*E move the unfold into the kernel (shifted pl.ds reads
    # of one padded input) to avoid materializing w shifted copies in HBM.
    xw_list = []
    for w in fltr_windows:
        half = (w - 1) // 2
        xpad = jnp.pad(xb, ((0, 0), (half, half), (0, 0)))
        xw = jnp.concatenate([xpad[:, d:d + L, :] for d in range(w)], axis=-1)  # (B, L, w*E)
        xw_list.append(xw.reshape(B * L, w * E).astype(jnp.bfloat16))

    feat = conv_bn_lrelu_fused(xw_list, p["conv_w"], p["conv_b"], p["bn_g"], p["bn_b"])
    feat = feat.reshape(B, L, -1)                                  # (B, L, d_sum) bf16

    out_bld = relation_mlp(feat, p)                                # (B, L, d_out) f32
    return jnp.transpose(out_bld, (1, 0, 2))                       # (L, B, d_out)


# ---------------------------------------------------------------------------
# Deterministic synthetic parameters (shapes as implied by RelationLayer.__init__)
# ---------------------------------------------------------------------------
def init_params(key, d_in, d_out, fltr_windows, d_fltr_feats, d_mlp=128):
    d_sum = sum(d_fltr_feats)
    keys = iter(jax.random.split(key, 64))

    def dense(shape):
        return jax.random.normal(next(keys), shape, jnp.float32) / math.sqrt(shape[0])

    def bias(n):
        return 0.01 * jax.random.normal(next(keys), (1, n), jnp.float32)

    p = {"conv_w": [], "conv_b": [], "bn_g": [], "bn_b": []}
    for w, f in zip(fltr_windows, d_fltr_feats):
        p["conv_w"].append(dense((w * d_in, f)))    # Conv1d weight (F,1,w*E) stored transposed
        p["conv_b"].append(bias(f))
        p["bn_g"].append(1.0 + 0.1 * jax.random.normal(next(keys), (1, f), jnp.float32))
        p["bn_b"].append(0.1 * jax.random.normal(next(keys), (1, f), jnp.float32))

    p["W1a"] = dense((d_sum, d_mlp)); p["W1b"] = dense((d_sum, d_mlp)); p["b1"] = bias(d_mlp)
    p["W2"] = dense((d_mlp, d_mlp)); p["b2"] = bias(d_mlp)
    p["W3"] = dense((d_mlp, d_mlp)); p["b3"] = bias(d_mlp)
    p["W4"] = dense((d_mlp, d_mlp)); p["b4"] = bias(d_mlp)
    p["W5"] = dense((d_mlp, d_mlp)); p["b5"] = bias(d_mlp)
    p["W6"] = dense((d_mlp, d_out)); p["b6"] = bias(d_out)
    return p


# ---------------------------------------------------------------------------
# Pure-JAX reference (same math, full f32 precision) for a correctness check
# ---------------------------------------------------------------------------
def reference_forward(x, p, fltr_windows):
    HI = jax.lax.Precision.HIGHEST
    L, B, E = x.shape
    xb = jnp.transpose(x, (1, 0, 2))
    feats = []
    for k, w in enumerate(fltr_windows):
        half = (w - 1) // 2
        xpad = jnp.pad(xb, ((0, 0), (half, half), (0, 0)))
        xw = jnp.concatenate([xpad[:, d:d + L, :] for d in range(w)], axis=-1).reshape(B * L, w * E)
        y = jnp.dot(xw, p["conv_w"][k], precision=HI) + p["conv_b"][k]
        mu = jnp.mean(y, axis=0, keepdims=True)
        var = jnp.mean((y - mu) ** 2, axis=0, keepdims=True)
        yn = (y - mu) * jax.lax.rsqrt(var + BN_EPS) * p["bn_g"][k] + p["bn_b"][k]
        feats.append(_lrelu(yn))
    feat = jnp.concatenate(feats, axis=-1).reshape(B, L, -1)
    featT = jnp.transpose(feat, (1, 0, 2))                         # (L, B, d_sum)
    S = featT.shape[-1]
    x1 = jnp.broadcast_to(featT[:, None], (L, L, B, S))
    x2 = jnp.broadcast_to(featT[None, :], (L, L, B, S))
    pair = jnp.concatenate([x1, x2], axis=-1)                      # (L, L, B, 2*d_sum)
    W1 = jnp.concatenate([p["W1a"], p["W1b"]], axis=0)
    h = _lrelu(jnp.dot(pair, W1, precision=HI) + p["b1"])
    h = _lrelu(jnp.dot(h, p["W2"], precision=HI) + p["b2"])
    h = _lrelu(jnp.dot(h, p["W3"], precision=HI) + p["b3"])
    h = _lrelu(jnp.dot(h, p["W4"], precision=HI) + p["b4"])
    h = jnp.mean(h, axis=1)                                        # mean over j -> (L, B, d_mlp)
    h = _lrelu(jnp.dot(h, p["W5"], precision=HI) + p["b5"])
    h = _lrelu(jnp.dot(h, p["W6"], precision=HI) + p["b6"])
    return h


if __name__ == "__main__":
    L, B, d_in = 8, 2, 16
    fltr_windows = (1, 3)          # odd windows, as the (w-1)/2 padding formula implies
    d_fltr_feats = (8, 8)
    d_mlp, d_out = 128, 32

    key = jax.random.PRNGKey(0)
    kx, kp = jax.random.split(key)
    x = jax.random.normal(kx, (L, B, d_in), jnp.float32)
    params = init_params(kp, d_in, d_out, fltr_windows, d_fltr_feats, d_mlp)

    fwd = jax.jit(functools.partial(relation_layer_forward, fltr_windows=fltr_windows))
    out = fwd(x, params)
    jax.block_until_ready(out)

    ref = reference_forward(x, params, fltr_windows)
    assert out.shape == (L, B, d_out), out.shape
    # Kernels intentionally use bf16 MXU inputs with f32 accumulation (perf);
    # compare against the pure-f32 reference with a scale-relative bound that is
    # loose enough for bf16 rounding but still catches any structural error.
    max_err = float(jnp.max(jnp.abs(out - ref)))
    scale = float(jnp.max(jnp.abs(ref)))
    assert max_err <= 2e-2 * max(scale, 1.0), f"max abs err {max_err}, ref scale {scale}"
    print("KERNEL_OK")
</pallas_src>

<mosaic_0001>
module attributes {stable_mosaic.version = 11 : i64} {
  func.func @kernel(%arg0: i32, %arg1: i32, %arg2: memref<1x8x16xbf16, #tpu.memory_space<vmem>>, %arg3: memref<16x128xbf16, #tpu.memory_space<vmem>>, %arg4: memref<16x128xbf16, #tpu.memory_space<vmem>>, %arg5: memref<1x128xf32, #tpu.memory_space<vmem>>, %arg6: memref<128x128xbf16, #tpu.memory_space<vmem>>, %arg7: memref<1x128xf32, #tpu.memory_space<vmem>>, %arg8: memref<128x128xbf16, #tpu.memory_space<vmem>>, %arg9: memref<1x128xf32, #tpu.memory_space<vmem>>, %arg10: memref<128x128xbf16, #tpu.memory_space<vmem>>, %arg11: memref<1x128xf32, #tpu.memory_space<vmem>>, %arg12: memref<128x128xbf16, #tpu.memory_space<vmem>>, %arg13: memref<1x128xf32, #tpu.memory_space<vmem>>, %arg14: memref<128x32xbf16, #tpu.memory_space<vmem>>, %arg15: memref<1x32xf32, #tpu.memory_space<vmem>>, %arg16: memref<1x8x32xf32, #tpu.memory_space<vmem>>) attributes {dimension_semantics = [#tpu.dimension_semantics<parallel>, #tpu.dimension_semantics<parallel>], iteration_bounds = array<i64: 2, 1>, scalar_prefetch = 0 : i64, scratch_operands = 0 : i64, tpu.core_type = #tpu.core_type<tc>, window_params = [{transform_indices = @transform_0, window_bounds = array<i64: 1, 8, 16>}, {pipeline_mode = #tpu.pipeline_mode<synchronous>, transform_indices = @transform_1, window_bounds = array<i64: 16, 128>}, {pipeline_mode = #tpu.pipeline_mode<synchronous>, transform_indices = @transform_2, window_bounds = array<i64: 16, 128>}, {pipeline_mode = #tpu.pipeline_mode<synchronous>, transform_indices = @transform_3, window_bounds = array<i64: 1, 128>}, {pipeline_mode = #tpu.pipeline_mode<synchronous>, transform_indices = @transform_4, window_bounds = array<i64: 128, 128>}, {pipeline_mode = #tpu.pipeline_mode<synchronous>, transform_indices = @transform_5, window_bounds = array<i64: 1, 128>}, {pipeline_mode = #tpu.pipeline_mode<synchronous>, transform_indices = @transform_6, window_bounds = array<i64: 128, 128>}, {pipeline_mode = #tpu.pipeline_mode<synchronous>, transform_indices = @transform_7, window_bounds = array<i64: 1, 128>}, {pipeline_mode = #tpu.pipeline_mode<synchronous>, transform_indices = @transform_8, window_bounds = array<i64: 128, 128>}, {pipeline_mode = #tpu.pipeline_mode<synchronous>, transform_indices = @transform_9, window_bounds = array<i64: 1, 128>}, {pipeline_mode = #tpu.pipeline_mode<synchronous>, transform_indices = @transform_10, window_bounds = array<i64: 128, 128>}, {pipeline_mode = #tpu.pipeline_mode<synchronous>, transform_indices = @transform_11, window_bounds = array<i64: 1, 128>}, {pipeline_mode = #tpu.pipeline_mode<synchronous>, transform_indices = @transform_12, window_bounds = array<i64: 128, 32>}, {pipeline_mode = #tpu.pipeline_mode<synchronous>, transform_indices = @transform_13, window_bounds = array<i64: 1, 32>}, {transform_indices = @transform_14, window_bounds = array<i64: 1, 8, 32>}]} {
    %c0 = arith.constant 0 : index
    %c0_0 = arith.constant 0 : index
    %c0_1 = arith.constant 0 : index
    %0 = vector.load %arg2[%c0, %c0_0, %c0_1] : memref<1x8x16xbf16, #tpu.memory_space<vmem>>, vector<1x8x16xbf16>
    %1 = vector.shape_cast %0 : vector<1x8x16xbf16> to vector<8x16xbf16>
    %c0_2 = arith.constant 0 : index
    %c0_3 = arith.constant 0 : index
    %2 = vector.load %arg3[%c0_2, %c0_3] : memref<16x128xbf16, #tpu.memory_space<vmem>>, vector<16x128xbf16>
    %cst = arith.constant dense<0.000000e+00> : vector<8x128xf32>
    %3 = tpu.matmul %1, %2, %cst {dimension_numbers = #tpu.dot_dimension_numbers<[1], [0], [0], [1], [0, 0, 1, 1], [], []>} : vector<8x16xbf16>, vector<16x128xbf16>, vector<8x128xf32> -> vector<8x128xf32>
    %c0_4 = arith.constant 0 : index
    %c0_5 = arith.constant 0 : index
    %4 = vector.load %arg5[%c0_4, %c0_5] : memref<1x128xf32, #tpu.memory_space<vmem>>, vector<1x128xf32>
    %5 = vector.broadcast %4 : vector<1x128xf32> to vector<8x128xf32>
    %6 = arith.addf %3, %5 : vector<8x128xf32>
    %cst_6 = arith.constant 0.000000e+00 : f32
    %7 = vector.broadcast %cst_6 : f32 to vector<8x128xf32>
    %c0_7 = arith.constant 0 : index
    %c0_8 = arith.constant 0 : index
    %c0_9 = arith.constant 0 : index
    %8 = vector.load %arg2[%c0_7, %c0_8, %c0_9] : memref<1x8x16xbf16, #tpu.memory_space<vmem>>, vector<1x8x16xbf16>
    %9 = vector.shape_cast %8 : vector<1x8x16xbf16> to vector<8x16xbf16>
    %c0_10 = arith.constant 0 : index
    %c0_11 = arith.constant 0 : index
    %10 = vector.load %arg4[%c0_10, %c0_11] : memref<16x128xbf16, #tpu.memory_space<vmem>>, vector<16x128xbf16>
    %cst_12 = arith.constant dense<0.000000e+00> : vector<8x128xf32>
    %11 = tpu.matmul %9, %10, %cst_12 {dimension_numbers = #tpu.dot_dimension_numbers<[1], [0], [0], [1], [0, 0, 1, 1], [], []>} : vector<8x16xbf16>, vector<16x128xbf16>, vector<8x128xf32> -> vector<8x128xf32>
    %12 = vector.shape_cast %6 : vector<8x128xf32> to vector<8x1x128xf32>
    %13 = vector.shape_cast %11 : vector<8x128xf32> to vector<1x8x128xf32>
    %14 = vector.broadcast %12 : vector<8x1x128xf32> to vector<8x8x128xf32>
    %15 = vector.broadcast %13 : vector<1x8x128xf32> to vector<8x8x128xf32>
    %16 = arith.addf %14, %15 : vector<8x8x128xf32>
    %cst_13 = arith.constant 0.000000e+00 : f32
    %17 = vector.broadcast %cst_13 : f32 to vector<8x8x128xf32>
    %18 = arith.cmpf oge, %16, %17 : vector<8x8x128xf32>
    %cst_14 = arith.constant 1.000000e-01 : f32
    %19 = vector.broadcast %cst_14 : f32 to vector<8x8x128xf32>
    %20 = arith.mulf %19, %16 : vector<8x8x128xf32>
    %21 = arith.select %18, %16, %20 : vector<8x8x128xi1>, vector<8x8x128xf32>
    %22 = vector.shape_cast %21 : vector<8x8x128xf32> to vector<64x128xf32>
    %23 = arith.truncf %22 : vector<64x128xf32> to vector<64x128xbf16>
    %c0_15 = arith.constant 0 : index
    %c0_16 = arith.constant 0 : index
    %24 = vector.load %arg6[%c0_15, %c0_16] : memref<128x128xbf16, #tpu.memory_space<vmem>>, vector<128x128xbf16>
    %cst_17 = arith.constant dense<0.000000e+00> : vector<64x128xf32>
    %25 = tpu.matmul %23, %24, %cst_17 {dimension_numbers = #tpu.dot_dimension_numbers<[1], [0], [0], [1], [0, 0, 1, 1], [], []>} : vector<64x128xbf16>, vector<128x128xbf16>, vector<64x128xf32> -> vector<64x128xf32>
    %c0_18 = arith.constant 0 : index
    %c0_19 = arith.constant 0 : index
    %26 = vector.load %arg7[%c0_18, %c0_19] : memref<1x128xf32, #tpu.memory_space<vmem>>, vector<1x128xf32>
    %27 = vector.broadcast %26 : vector<1x128xf32> to vector<64x128xf32>
    %28 = arith.addf %25, %27 : vector<64x128xf32>
    %cst_20 = arith.constant 0.000000e+00 : f32
    %29 = vector.broadcast %cst_20 : f32 to vector<64x128xf32>
    %30 = arith.cmpf oge, %28, %29 : vector<64x128xf32>
    %cst_21 = arith.constant 1.000000e-01 : f32
    %31 = vector.broadcast %cst_21 : f32 to vector<64x128xf32>
    %32 = arith.mulf %31, %28 : vector<64x128xf32>
    %33 = arith.select %30, %28, %32 : vector<64x128xi1>, vector<64x128xf32>
    %34 = arith.truncf %33 : vector<64x128xf32> to vector<64x128xbf16>
    %c0_22 = arith.constant 0 : index
    %c0_23 = arith.constant 0 : index
    %35 = vector.load %arg8[%c0_22, %c0_23] : memref<128x128xbf16, #tpu.memory_space<vmem>>, vector<128x128xbf16>
    %cst_24 = arith.constant dense<0.000000e+00> : vector<64x128xf32>
    %36 = tpu.matmul %34, %35, %cst_24 {dimension_numbers = #tpu.dot_dimension_numbers<[1], [0], [0], [1], [0, 0, 1, 1], [], []>} : vector<64x128xbf16>, vector<128x128xbf16>, vector<64x128xf32> -> vector<64x128xf32>
    %c0_25 = arith.constant 0 : index
    %c0_26 = arith.constant 0 : index
    %37 = vector.load %arg9[%c0_25, %c0_26] : memref<1x128xf32, #tpu.memory_space<vmem>>, vector<1x128xf32>
    %38 = vector.broadcast %37 : vector<1x128xf32> to vector<64x128xf32>
    %39 = arith.addf %36, %38 : vector<64x128xf32>
    %cst_27 = arith.constant 0.000000e+00 : f32
    %40 = vector.broadcast %cst_27 : f32 to vector<64x128xf32>
    %41 = arith.cmpf oge, %39, %40 : vector<64x128xf32>
    %cst_28 = arith.constant 1.000000e-01 : f32
    %42 = vector.broadcast %cst_28 : f32 to vector<64x128xf32>
    %43 = arith.mulf %42, %39 : vector<64x128xf32>
    %44 = arith.select %41, %39, %43 : vector<64x128xi1>, vector<64x128xf32>
    %45 = arith.truncf %44 : vector<64x128xf32> to vector<64x128xbf16>
    %c0_29 = arith.constant 0 : index
    %c0_30 = arith.constant 0 : index
    %46 = vector.load %arg10[%c0_29, %c0_30] : memref<128x128xbf16, #tpu.memory_space<vmem>>, vector<128x128xbf16>
    %cst_31 = arith.constant dense<0.000000e+00> : vector<64x128xf32>
    %47 = tpu.matmul %45, %46, %cst_31 {dimension_numbers = #tpu.dot_dimension_numbers<[1], [0], [0], [1], [0, 0, 1, 1], [], []>} : vector<64x128xbf16>, vector<128x128xbf16>, vector<64x128xf32> -> vector<64x128xf32>
    %c0_32 = arith.constant 0 : index
    %c0_33 = arith.constant 0 : index
    %48 = vector.load %arg11[%c0_32, %c0_33] : memref<1x128xf32, #tpu.memory_space<vmem>>, vector<1x128xf32>
    %49 = vector.broadcast %48 : vector<1x128xf32> to vector<64x128xf32>
    %50 = arith.addf %47, %49 : vector<64x128xf32>
    %cst_34 = arith.constant 0.000000e+00 : f32
    %51 = vector.broadcast %cst_34 : f32 to vector<64x128xf32>
    %52 = arith.cmpf oge, %50, %51 : vector<64x128xf32>
    %cst_35 = arith.constant 1.000000e-01 : f32
    %53 = vector.broadcast %cst_35 : f32 to vector<64x128xf32>
    %54 = arith.mulf %53, %50 : vector<64x128xf32>
    %55 = arith.select %52, %50, %54 : vector<64x128xi1>, vector<64x128xf32>
    %56 = vector.shape_cast %55 : vector<64x128xf32> to vector<8x8x128xf32>
    %cst_36 = arith.constant dense<0.000000e+00> : vector<8x128xf32>
    %57 = vector.multi_reduction <add>, %56, %cst_36 [1] : vector<8x8x128xf32> to vector<8x128xf32>
    %58 = arith.addf %7, %57 : vector<8x128xf32>
    %cst_37 = arith.constant 1.250000e-01 : f32
    %59 = vector.broadcast %cst_37 : f32 to vector<8x128xf32>
    %60 = arith.mulf %58, %59 : vector<8x128xf32>
    %61 = arith.truncf %60 : vector<8x128xf32> to vector<8x128xbf16>
    %c0_38 = arith.constant 0 : index
    %c0_39 = arith.constant 0 : index
    %62 = vector.load %arg12[%c0_38, %c0_39] : memref<128x128xbf16, #tpu.memory_space<vmem>>, vector<128x128xbf16>
    %cst_40 = arith.constant dense<0.000000e+00> : vector<8x128xf32>
    %63 = tpu.matmul %61, %62, %cst_40 {dimension_numbers = #tpu.dot_dimension_numbers<[1], [0], [0], [1], [0, 0, 1, 1], [], []>} : vector<8x128xbf16>, vector<128x128xbf16>, vector<8x128xf32> -> vector<8x128xf32>
    %c0_41 = arith.constant 0 : index
    %c0_42 = arith.constant 0 : index
    %64 = vector.load %arg13[%c0_41, %c0_42] : memref<1x128xf32, #tpu.memory_space<vmem>>, vector<1x128xf32>
    %65 = vector.broadcast %64 : vector<1x128xf32> to vector<8x128xf32>
    %66 = arith.addf %63, %65 : vector<8x128xf32>
    %cst_43 = arith.constant 0.000000e+00 : f32
    %67 = vector.broadcast %cst_43 : f32 to vector<8x128xf32>
    %68 = arith.cmpf oge, %66, %67 : vector<8x128xf32>
    %cst_44 = arith.constant 1.000000e-01 : f32
    %69 = vector.broadcast %cst_44 : f32 to vector<8x128xf32>
    %70 = arith.mulf %69, %66 : vector<8x128xf32>
    %71 = arith.select %68, %66, %70 : vector<8x128xi1>, vector<8x128xf32>
    %72 = arith.truncf %71 : vector<8x128xf32> to vector<8x128xbf16>
    %c0_45 = arith.constant 0 : index
    %c0_46 = arith.constant 0 : index
    %73 = vector.load %arg14[%c0_45, %c0_46] : memref<128x32xbf16, #tpu.memory_space<vmem>>, vector<128x32xbf16>
    %cst_47 = arith.constant dense<0.000000e+00> : vector<8x32xf32>
    %74 = tpu.matmul %72, %73, %cst_47 {dimension_numbers = #tpu.dot_dimension_numbers<[1], [0], [0], [1], [0, 0, 1, 1], [], []>} : vector<8x128xbf16>, vector<128x32xbf16>, vector<8x32xf32> -> vector<8x32xf32>
    %c0_48 = arith.constant 0 : index
    %c0_49 = arith.constant 0 : index
    %75 = vector.load %arg15[%c0_48, %c0_49] : memref<1x32xf32, #tpu.memory_space<vmem>>, vector<1x32xf32>
    %76 = vector.broadcast %75 : vector<1x32xf32> to vector<8x32xf32>
    %77 = arith.addf %74, %76 : vector<8x32xf32>
    %cst_50 = arith.constant 0.000000e+00 : f32
    %78 = vector.broadcast %cst_50 : f32 to vector<8x32xf32>
    %79 = arith.cmpf oge, %77, %78 : vector<8x32xf32>
    %cst_51 = arith.constant 1.000000e-01 : f32
    %80 = vector.broadcast %cst_51 : f32 to vector<8x32xf32>
    %81 = arith.mulf %80, %77 : vector<8x32xf32>
    %82 = arith.select %79, %77, %81 : vector<8x32xi1>, vector<8x32xf32>
    %c0_52 = arith.constant 0 : index
    %c0_53 = arith.constant 0 : index
    %c0_54 = arith.constant 0 : index
    %83 = vector.load %arg16[%c0_52, %c0_53, %c0_54] : memref<1x8x32xf32, #tpu.memory_space<vmem>>, vector<1x8x32xf32>
    %84 = vector.shape_cast %83 : vector<1x8x32xf32> to vector<8x32xf32>
    %85 = vector.shape_cast %82 : vector<8x32xf32> to vector<1x8x32xf32>
    tpu.vector_store %arg16[%c0_52, %c0_53, %c0_54], %85 {strides = array<i32>} : memref<1x8x32xf32, #tpu.memory_space<vmem>>, vector<1x8x32xf32>,
    return
  }
  func.func @transform_0(%arg0: i32, %arg1: i32) -> (i32, i32, i32) {
    %c0_i32 = arith.constant 0 : i32
    %c0_i32_0 = arith.constant 0 : i32
    %c0_i32_1 = arith.constant 0 : i32
    return %arg0, %c0_i32, %c0_i32_0 : i32, i32, i32
  }
  func.func @transform_1(%arg0: i32, %arg1: i32) -> (i32, i32) {
    %c0_i32 = arith.constant 0 : i32
    %c0_i32_0 = arith.constant 0 : i32
    %c0_i32_1 = arith.constant 0 : i32
    return %c0_i32, %c0_i32_0 : i32, i32
  }
  func.func @transform_2(%arg0: i32, %arg1: i32) -> (i32, i32) {
    %c0_i32 = arith.constant 0 : i32
    %c0_i32_0 = arith.constant 0 : i32
    %c0_i32_1 = arith.constant 0 : i32
    return %c0_i32, %c0_i32_0 : i32, i32
  }
  func.func @transform_3(%arg0: i32, %arg1: i32) -> (i32, i32) {
    %c0_i32 = arith.constant 0 : i32
    %c0_i32_0 = arith.constant 0 : i32
    %c0_i32_1 = arith.constant 0 : i32
    return %c0_i32, %c0_i32_0 : i32, i32
  }
  func.func @transform_4(%arg0: i32, %arg1: i32) -> (i32, i32) {
    %c0_i32 = arith.constant 0 : i32
    %c0_i32_0 = arith.constant 0 : i32
    %c0_i32_1 = arith.constant 0 : i32
    return %c0_i32, %c0_i32_0 : i32, i32
  }
  func.func @transform_5(%arg0: i32, %arg1: i32) -> (i32, i32) {
    %c0_i32 = arith.constant 0 : i32
    %c0_i32_0 = arith.constant 0 : i32
    %c0_i32_1 = arith.constant 0 : i32
    return %c0_i32, %c0_i32_0 : i32, i32
  }
  func.func @transform_6(%arg0: i32, %arg1: i32) -> (i32, i32) {
    %c0_i32 = arith.constant 0 : i32
    %c0_i32_0 = arith.constant 0 : i32
    %c0_i32_1 = arith.constant 0 : i32
    return %c0_i32, %c0_i32_0 : i32, i32
  }
  func.func @transform_7(%arg0: i32, %arg1: i32) -> (i32, i32) {
    %c0_i32 = arith.constant 0 : i32
    %c0_i32_0 = arith.constant 0 : i32
    %c0_i32_1 = arith.constant 0 : i32
    return %c0_i32, %c0_i32_0 : i32, i32
  }
  func.func @transform_8(%arg0: i32, %arg1: i32) -> (i32, i32) {
    %c0_i32 = arith.constant 0 : i32
    %c0_i32_0 = arith.constant 0 : i32
    %c0_i32_1 = arith.constant 0 : i32
    return %c0_i32, %c0_i32_0 : i32, i32
  }
  func.func @transform_9(%arg0: i32, %arg1: i32) -> (i32, i32) {
    %c0_i32 = arith.constant 0 : i32
    %c0_i32_0 = arith.constant 0 : i32
    %c0_i32_1 = arith.constant 0 : i32
    return %c0_i32, %c0_i32_0 : i32, i32
  }
  func.func @transform_10(%arg0: i32, %arg1: i32) -> (i32, i32) {
    %c0_i32 = arith.constant 0 : i32
    %c0_i32_0 = arith.constant 0 : i32
    %c0_i32_1 = arith.constant 0 : i32
    return %c0_i32, %c0_i32_0 : i32, i32
  }
  func.func @transform_11(%arg0: i32, %arg1: i32) -> (i32, i32) {
    %c0_i32 = arith.constant 0 : i32
    %c0_i32_0 = arith.constant 0 : i32
    %c0_i32_1 = arith.constant 0 : i32
    return %c0_i32, %c0_i32_0 : i32, i32
  }
  func.func @transform_12(%arg0: i32, %arg1: i32) -> (i32, i32) {
    %c0_i32 = arith.constant 0 : i32
    %c0_i32_0 = arith.constant 0 : i32
    %c0_i32_1 = arith.constant 0 : i32
    return %c0_i32, %c0_i32_0 : i32, i32
  }
  func.func @transform_13(%arg0: i32, %arg1: i32) -> (i32, i32) {
    %c0_i32 = arith.constant 0 : i32
    %c0_i32_0 = arith.constant 0 : i32
    %c0_i32_1 = arith.constant 0 : i32
    return %c0_i32, %c0_i32_0 : i32, i32
  }
  func.func @transform_14(%arg0: i32, %arg1: i32) -> (i32, i32, i32) {
    %c0_i32 = arith.constant 0 : i32
    %c0_i32_0 = arith.constant 0 : i32
    return %arg0, %arg1, %c0_i32 : i32, i32, i32
  }
}

module attributes {stable_mosaic.version = 11 : i64} {
  func.func @kernel(%arg0: i32, %arg1: memref<16x16xbf16, #tpu.memory_space<vmem>>, %arg2: memref<16x8xbf16, #tpu.memory_space<vmem>>, %arg3: memref<1x8xf32, #tpu.memory_space<vmem>>, %arg4: memref<1x8xf32, #tpu.memory_space<vmem>>, %arg5: memref<1x8xf32, #tpu.memory_space<vmem>>, %arg6: memref<16x48xbf16, #tpu.memory_space<vmem>>, %arg7: memref<48x8xbf16, #tpu.memory_space<vmem>>, %arg8: memref<1x8xf32, #tpu.memory_space<vmem>>, %arg9: memref<1x8xf32, #tpu.memory_space<vmem>>, %arg10: memref<1x8xf32, #tpu.memory_space<vmem>>, %arg11: memref<16x16xbf16, #tpu.memory_space<vmem>>) attributes {dimension_semantics = [#tpu.dimension_semantics<arbitrary>], iteration_bounds = array<i64: 1>, scalar_prefetch = 0 : i64, scratch_operands = 0 : i64, tpu.core_type = #tpu.core_type<tc>, window_params = [{pipeline_mode = #tpu.pipeline_mode<synchronous>, transform_indices = @transform_0, window_bounds = array<i64: 16, 16>}, {pipeline_mode = #tpu.pipeline_mode<synchronous>, transform_indices = @transform_1, window_bounds = array<i64: 16, 8>}, {pipeline_mode = #tpu.pipeline_mode<synchronous>, transform_indices = @transform_2, window_bounds = array<i64: 1, 8>}, {pipeline_mode = #tpu.pipeline_mode<synchronous>, transform_indices = @transform_3, window_bounds = array<i64: 1, 8>}, {pipeline_mode = #tpu.pipeline_mode<synchronous>, transform_indices = @transform_4, window_bounds = array<i64: 1, 8>}, {pipeline_mode = #tpu.pipeline_mode<synchronous>, transform_indices = @transform_5, window_bounds = array<i64: 16, 48>}, {pipeline_mode = #tpu.pipeline_mode<synchronous>, transform_indices = @transform_6, window_bounds = array<i64: 48, 8>}, {pipeline_mode = #tpu.pipeline_mode<synchronous>, transform_indices = @transform_7, window_bounds = array<i64: 1, 8>}, {pipeline_mode = #tpu.pipeline_mode<synchronous>, transform_indices = @transform_8, window_bounds = array<i64: 1, 8>}, {pipeline_mode = #tpu.pipeline_mode<synchronous>, transform_indices = @transform_9, window_bounds = array<i64: 1, 8>}, {pipeline_mode = #tpu.pipeline_mode<synchronous>, transform_indices = @transform_10, window_bounds = array<i64: 16, 16>}]} {
    %c0 = arith.constant 0 : index
    %c0_0 = arith.constant 0 : index
    %0 = vector.load %arg1[%c0, %c0_0] : memref<16x16xbf16, #tpu.memory_space<vmem>>, vector<16x16xbf16>
    %c0_1 = arith.constant 0 : index
    %c0_2 = arith.constant 0 : index
    %1 = vector.load %arg2[%c0_1, %c0_2] : memref<16x8xbf16, #tpu.memory_space<vmem>>, vector<16x8xbf16>
    %cst = arith.constant dense<0.000000e+00> : vector<16x8xf32>
    %2 = tpu.matmul %0, %1, %cst {dimension_numbers = #tpu.dot_dimension_numbers<[1], [0], [0], [1], [0, 0, 1, 1], [], []>} : vector<16x16xbf16>, vector<16x8xbf16>, vector<16x8xf32> -> vector<16x8xf32>
    %c0_3 = arith.constant 0 : index
    %c0_4 = arith.constant 0 : index
    %3 = vector.load %arg3[%c0_3, %c0_4] : memref<1x8xf32, #tpu.memory_space<vmem>>, vector<1x8xf32>
    %4 = vector.broadcast %3 : vector<1x8xf32> to vector<16x8xf32>
    %5 = arith.addf %2, %4 : vector<16x8xf32>
    %cst_5 = arith.constant dense<0.000000e+00> : vector<8xf32>
    %6 = vector.multi_reduction <add>, %5, %cst_5 [0] : vector<16x8xf32> to vector<8xf32>
    %7 = vector.shape_cast %6 : vector<8xf32> to vector<1x8xf32>
    %cst_6 = arith.constant 1.600000e+01 : f32
    %8 = vector.broadcast %cst_6 : f32 to vector<1x8xf32>
    %9 = arith.divf %7, %8 : vector<1x8xf32>
    %10 = vector.broadcast %9 : vector<1x8xf32> to vector<16x8xf32>
    %11 = arith.subf %5, %10 : vector<16x8xf32>
    %12 = arith.mulf %11, %11 : vector<16x8xf32>
    %cst_7 = arith.constant dense<0.000000e+00> : vector<8xf32>
    %13 = vector.multi_reduction <add>, %12, %cst_7 [0] : vector<16x8xf32> to vector<8xf32>
    %14 = vector.shape_cast %13 : vector<8xf32> to vector<1x8xf32>
    %cst_8 = arith.constant 1.600000e+01 : f32
    %15 = vector.broadcast %cst_8 : f32 to vector<1x8xf32>
    %16 = arith.divf %14, %15 : vector<1x8xf32>
    %17 = vector.broadcast %9 : vector<1x8xf32> to vector<16x8xf32>
    %18 = arith.subf %5, %17 : vector<16x8xf32>
    %cst_9 = arith.constant 9.99999974E-6 : f32
    %19 = vector.broadcast %cst_9 : f32 to vector<1x8xf32>
    %20 = arith.addf %16, %19 : vector<1x8xf32>
    %21 = math.rsqrt %20 : vector<1x8xf32>
    %22 = vector.broadcast %21 : vector<1x8xf32> to vector<16x8xf32>
    %23 = arith.mulf %18, %22 : vector<16x8xf32>
    %c0_10 = arith.constant 0 : index
    %c0_11 = arith.constant 0 : index
    %24 = vector.load %arg4[%c0_10, %c0_11] : memref<1x8xf32, #tpu.memory_space<vmem>>, vector<1x8xf32>
    %25 = vector.broadcast %24 : vector<1x8xf32> to vector<16x8xf32>
    %26 = arith.mulf %23, %25 : vector<16x8xf32>
    %c0_12 = arith.constant 0 : index
    %c0_13 = arith.constant 0 : index
    %27 = vector.load %arg5[%c0_12, %c0_13] : memref<1x8xf32, #tpu.memory_space<vmem>>, vector<1x8xf32>
    %28 = vector.broadcast %27 : vector<1x8xf32> to vector<16x8xf32>
    %29 = arith.addf %26, %28 : vector<16x8xf32>
    %cst_14 = arith.constant 0.000000e+00 : f32
    %30 = vector.broadcast %cst_14 : f32 to vector<16x8xf32>
    %31 = arith.cmpf oge, %29, %30 : vector<16x8xf32>
    %cst_15 = arith.constant 1.000000e-01 : f32
    %32 = vector.broadcast %cst_15 : f32 to vector<16x8xf32>
    %33 = arith.mulf %32, %29 : vector<16x8xf32>
    %34 = arith.select %31, %29, %33 : vector<16x8xi1>, vector<16x8xf32>
    %35 = arith.truncf %34 : vector<16x8xf32> to vector<16x8xbf16>
    %c0_16 = arith.constant 0 : index
    %c0_17 = arith.constant 0 : index
    %36 = vector.load %arg11[%c0_16, %c0_17] : memref<16x16xbf16, #tpu.memory_space<vmem>>, vector<16x8xbf16>
    tpu.vector_store %arg11[%c0_16, %c0_17], %35 {strides = array<i32>} : memref<16x16xbf16, #tpu.memory_space<vmem>>, vector<16x8xbf16>,
    %c0_18 = arith.constant 0 : index
    %c0_19 = arith.constant 0 : index
    %37 = vector.load %arg6[%c0_18, %c0_19] : memref<16x48xbf16, #tpu.memory_space<vmem>>, vector<16x48xbf16>
    %c0_20 = arith.constant 0 : index
    %c0_21 = arith.constant 0 : index
    %38 = vector.load %arg7[%c0_20, %c0_21] : memref<48x8xbf16, #tpu.memory_space<vmem>>, vector<48x8xbf16>
    %cst_22 = arith.constant dense<0.000000e+00> : vector<16x8xf32>
    %39 = tpu.matmul %37, %38, %cst_22 {dimension_numbers = #tpu.dot_dimension_numbers<[1], [0], [0], [1], [0, 0, 1, 1], [], []>} : vector<16x48xbf16>, vector<48x8xbf16>, vector<16x8xf32> -> vector<16x8xf32>
    %c0_23 = arith.constant 0 : index
    %c0_24 = arith.constant 0 : index
    %40 = vector.load %arg8[%c0_23, %c0_24] : memref<1x8xf32, #tpu.memory_space<vmem>>, vector<1x8xf32>
    %41 = vector.broadcast %40 : vector<1x8xf32> to vector<16x8xf32>
    %42 = arith.addf %39, %41 : vector<16x8xf32>
    %cst_25 = arith.constant dense<0.000000e+00> : vector<8xf32>
    %43 = vector.multi_reduction <add>, %42, %cst_25 [0] : vector<16x8xf32> to vector<8xf32>
    %44 = vector.shape_cast %43 : vector<8xf32> to vector<1x8xf32>
    %cst_26 = arith.constant 1.600000e+01 : f32
    %45 = vector.broadcast %cst_26 : f32 to vector<1x8xf32>
    %46 = arith.divf %44, %45 : vector<1x8xf32>
    %47 = vector.broadcast %46 : vector<1x8xf32> to vector<16x8xf32>
    %48 = arith.subf %42, %47 : vector<16x8xf32>
    %49 = arith.mulf %48, %48 : vector<16x8xf32>
    %cst_27 = arith.constant dense<0.000000e+00> : vector<8xf32>
    %50 = vector.multi_reduction <add>, %49, %cst_27 [0] : vector<16x8xf32> to vector<8xf32>
    %51 = vector.shape_cast %50 : vector<8xf32> to vector<1x8xf32>
    %cst_28 = arith.constant 1.600000e+01 : f32
    %52 = vector.broadcast %cst_28 : f32 to vector<1x8xf32>
    %53 = arith.divf %51, %52 : vector<1x8xf32>
    %54 = vector.broadcast %46 : vector<1x8xf32> to vector<16x8xf32>
    %55 = arith.subf %42, %54 : vector<16x8xf32>
    %cst_29 = arith.constant 9.99999974E-6 : f32
    %56 = vector.broadcast %cst_29 : f32 to vector<1x8xf32>
    %57 = arith.addf %53, %56 : vector<1x8xf32>
    %58 = math.rsqrt %57 : vector<1x8xf32>
    %59 = vector.broadcast %58 : vector<1x8xf32> to vector<16x8xf32>
    %60 = arith.mulf %55, %59 : vector<16x8xf32>
    %c0_30 = arith.constant 0 : index
    %c0_31 = arith.constant 0 : index
    %61 = vector.load %arg9[%c0_30, %c0_31] : memref<1x8xf32, #tpu.memory_space<vmem>>, vector<1x8xf32>
    %62 = vector.broadcast %61 : vector<1x8xf32> to vector<16x8xf32>
    %63 = arith.mulf %60, %62 : vector<16x8xf32>
    %c0_32 = arith.constant 0 : index
    %c0_33 = arith.constant 0 : index
    %64 = vector.load %arg10[%c0_32, %c0_33] : memref<1x8xf32, #tpu.memory_space<vmem>>, vector<1x8xf32>
    %65 = vector.broadcast %64 : vector<1x8xf32> to vector<16x8xf32>
    %66 = arith.addf %63, %65 : vector<16x8xf32>
    %cst_34 = arith.constant 0.000000e+00 : f32
    %67 = vector.broadcast %cst_34 : f32 to vector<16x8xf32>
    %68 = arith.cmpf oge, %66, %67 : vector<16x8xf32>
    %cst_35 = arith.constant 1.000000e-01 : f32
    %69 = vector.broadcast %cst_35 : f32 to vector<16x8xf32>
    %70 = arith.mulf %69, %66 : vector<16x8xf32>
    %71 = arith.select %68, %66, %70 : vector<16x8xi1>, vector<16x8xf32>
    %72 = arith.truncf %71 : vector<16x8xf32> to vector<16x8xbf16>
    %c0_36 = arith.constant 0 : index
    %c8 = arith.constant 8 : index
    %73 = vector.load %arg11[%c0_36, %c8] : memref<16x16xbf16, #tpu.memory_space<vmem>>, vector<16x8xbf16>
    tpu.vector_store %arg11[%c0_36, %c8], %72 {strides = array<i32>} : memref<16x16xbf16, #tpu.memory_space<vmem>>, vector<16x8xbf16>,
    return
  }
  func.func @transform_0(%arg0: i32) -> (i32, i32) {
    %c0_i32 = arith.constant 0 : i32
    %c0_i32_0 = arith.constant 0 : i32
    %c0_i32_1 = arith.constant 0 : i32
    return %c0_i32, %c0_i32_0 : i32, i32
  }
  func.func @transform_1(%arg0: i32) -> (i32, i32) {
    %c0_i32 = arith.constant 0 : i32
    %c0_i32_0 = arith.constant 0 : i32
    %c0_i32_1 = arith.constant 0 : i32
    return %c0_i32, %c0_i32_0 : i32, i32
  }
  func.func @transform_2(%arg0: i32) -> (i32, i32) {
    %c0_i32 = arith.constant 0 : i32
    %c0_i32_0 = arith.constant 0 : i32
    %c0_i32_1 = arith.constant 0 : i32
    return %c0_i32, %c0_i32_0 : i32, i32
  }
  func.func @transform_3(%arg0: i32) -> (i32, i32) {
    %c0_i32 = arith.constant 0 : i32
    %c0_i32_0 = arith.constant 0 : i32
    %c0_i32_1 = arith.constant 0 : i32
    return %c0_i32, %c0_i32_0 : i32, i32
  }
  func.func @transform_4(%arg0: i32) -> (i32, i32) {
    %c0_i32 = arith.constant 0 : i32
    %c0_i32_0 = arith.constant 0 : i32
    %c0_i32_1 = arith.constant 0 : i32
    return %c0_i32, %c0_i32_0 : i32, i32
  }
  func.func @transform_5(%arg0: i32) -> (i32, i32) {
    %c0_i32 = arith.constant 0 : i32
    %c0_i32_0 = arith.constant 0 : i32
    %c0_i32_1 = arith.constant 0 : i32
    return %c0_i32, %c0_i32_0 : i32, i32
  }
  func.func @transform_6(%arg0: i32) -> (i32, i32) {
    %c0_i32 = arith.constant 0 : i32
    %c0_i32_0 = arith.constant 0 : i32
    %c0_i32_1 = arith.constant 0 : i32
    return %c0_i32, %c0_i32_0 : i32, i32
  }
  func.func @transform_7(%arg0: i32) -> (i32, i32) {
    %c0_i32 = arith.constant 0 : i32
    %c0_i32_0 = arith.constant 0 : i32
    %c0_i32_1 = arith.constant 0 : i32
    return %c0_i32, %c0_i32_0 : i32, i32
  }
  func.func @transform_8(%arg0: i32) -> (i32, i32) {
    %c0_i32 = arith.constant 0 : i32
    %c0_i32_0 = arith.constant 0 : i32
    %c0_i32_1 = arith.constant 0 : i32
    return %c0_i32, %c0_i32_0 : i32, i32
  }
  func.func @transform_9(%arg0: i32) -> (i32, i32) {
    %c0_i32 = arith.constant 0 : i32
    %c0_i32_0 = arith.constant 0 : i32
    %c0_i32_1 = arith.constant 0 : i32
    return %c0_i32, %c0_i32_0 : i32, i32
  }
  func.func @transform_10(%arg0: i32) -> (i32, i32) {
    %c0_i32 = arith.constant 0 : i32
    %c0_i32_0 = arith.constant 0 : i32
    %c0_i32_1 = arith.constant 0 : i32
    return %c0_i32, %c0_i32_0 : i32, i32
  }
}

</mosaic_0001>

<bundles_post_ra>
// kernel: relation_layer_forward.2
= control target key start
LH: loop header
LB: loop body
LE: loop exit
PB: predicated region body
PF: predicated region fallthrough
CT: control target
= control target key end

     0   :  { %v379_v0 = vmov 0.0   ;;  %vm380_vm0 = vmmov 0   ;;  %vm58_vm1 = vcmask 130048   ;;  %vm206_vm2 = vcmask 392192   ;;  %s381_s11 = smov 8   ;;  %s493_s6 = inlined_call_operand.vmem [shape: bf16[48,8], index: 6, kind: input, shape index: {}]   ;;  %s494_s1 = inlined_call_operand.vmem [shape: bf16[16,8], index: 1, kind: input, shape index: {}]   ;;  %s495_s5 = inlined_call_operand.vmem [shape: bf16[16,48], index: 5, kind: input, shape index: {}]   ;;  %s496_s0 = inlined_call_operand.vmem [shape: bf16[16,16], index: 0, kind: input, shape index: {}]   ;;  %s497_s2 = inlined_call_operand.vmem [shape: f32[1,8], index: 2, kind: input, shape index: {}]   ;;  %s498_s7 = inlined_call_operand.vmem [shape: f32[1,8], index: 7, kind: input, shape index: {}]   ;;  %s499_s3 = inlined_call_operand.vmem [shape: f32[1,8], index: 3, kind: input, shape index: {}]   ;;  %s500_s4 = inlined_call_operand.vmem [shape: f32[1,8], index: 4, kind: input, shape index: {}]   ;;  %s501_s8 = inlined_call_operand.vmem [shape: f32[1,8], index: 8, kind: input, shape index: {}]   ;;  %s502_s9 = inlined_call_operand.vmem [shape: f32[1,8], index: 9, kind: input, shape index: {}]   ;;  %s503_s10 = inlined_call_operand.vmem [shape: bf16[16,16], index: 10, kind: output, shape index: {}]  }
   0x1   :  { %356 = vmatprep.subr.bf16.mxu1 %v379_v0  ;;  %v369_v1 = vld [vmem:[%s493_s6] sm:$0xff]   ;;  %362 = vmatprep.mubr.msk.bf16.mxu1 %vm380_vm0, %v379_v0  ;;  %v370_v2 = vld [vmem:[%s493_s6 + $0x8] sm:$0xff]   ;;  %v371_v5 = vld [vmem:[%s493_s6 + $0x10] sm:$0xff]   ;;  %vm103_vm3 = vcmask 64512   ;;  %vm165_vm6 = vcmask 60416   ;;  %vm315_vm9 = vcmask 126016  }
   0x2   :  { %350 = vmatprep.subr.bf16.mxu0 %v379_v0  ;;  %352 = vmatprep.mubr.msk.bf16.mxu0 %vm380_vm0, %v379_v0  ;;  %v373_v3 = vld [vmem:[%s494_s1] sm:$0xff]  }
   0x3   :  { %357 = vmatpush3.bf16.msra.mxu1 %v369_v1  ;;  %v374_v4 = vld [vmem:[%s496_s0] sm:$0xff]   ;;  %351 = vmatpush3.bf16.msra.mxu0 %v373_v3 }
   0x4   :  { %358 = vmatprep.subr.bf16.mxu1 %v379_v0  ;;  %v372_v6 = vld [vmem:[%s495_s5] sm:$0xff]  }
   0x5   :  { %v322_v7 = vld [vmem:[%s497_s2] ss:$0 sm:$0xff] }
   0x6   :  { %353 = vmatmul.mubr.msk.bf16.vlgmr.msra.gmra.mrb[0].mxu0 %vm58_vm1, %v374_v4  ;;  %v330_v11 = vld [vmem:[%s498_s7] ss:$0 sm:$0xff] }
   0x7   :  { %359 = vmatpush3.bf16.msra.mxu1 %v370_v2 }
   0x8   :  { %360 = vmatprep.subr.bf16.mxu1 %v379_v0 }
   0xb   :  { %361 = vmatpush3.bf16.msra.mxu1 %v371_v5 }
   0xe   :  { %363 = vmatmul.mubr.msk.bf16.vlgmr.msra.gmra.mrb[0].mxu1 %vm206_vm2, %v372_v6 }
  0xd9   :  { %v96_v8 = vpop.f32.mrb[0].mxu0 }
  0xda   :  { %v97_v9 = vadd.f32 %v322_v7, %v96_v8  ;;  %v354_v10 = vpop.f32.mrb[1].mxu0  ;;  %v326_v8 = vld [vmem:[%s499_s3] ss:$0 sm:$0xff] }
  0xdb   :  { %v99_v12 = vpop.f32.mrb[2].mxu0 }
  0xdc   :  { %v104_v13 = vsel %vm103_vm3, %v97_v9, 0.0  ;;  %v100_v14 = vadd.f32 %v322_v7, %v99_v12  ;;  %v355_v15 = vpop.f32.mrb[3].mxu0 }
  0xdd   :  { %v336_v15 = vld [vmem:[%s501_s8] ss:$0 sm:$0xff] }
  0xde   :  { %v105_v19 = vsel %vm103_vm3, %v100_v14, 0.0 }
  0xdf   :  { %v106_v21 = vadd.f32 %v105_v19, %v104_v13 }
  0xe1   :  { %v244_v16 = vpop.f32.mrb[0].mxu1  ;;  %v107_v24 = vrot.slane %v106_v21, 4 }
  0xe2   :  { %v245_v17 = vadd.f32 %v330_v11, %v244_v16  ;;  %v364_v18 = vpop.f32.mrb[1].mxu1 }
  0xe3   :  { %v247_v20 = vpop.f32.mrb[2].mxu1  ;;  %v108_v28 = vadd.f32 %v107_v24, %v106_v21 }
  0xe4   :  { %v248_v22 = vadd.f32 %v330_v11, %v247_v20  ;;  %v365_v23 = vpop.f32.mrb[3].mxu1  ;;  %v251_v25 = vsel %vm103_vm3, %v245_v17, 0.0  ;;  %v327_v11 = vld [vmem:[%s500_s4] ss:$0 sm:$0xff] }
  0xe5   :  { %v109_v30 = vrot.slane %v108_v28, 2  ;;  %v337_v20 = vld [vmem:[%s502_s9] ss:$0 sm:$0xff] }
  0xe6   :  { %v252_v26 = vsel %vm103_vm3, %v248_v22, 0.0 }
  0xe7   :  { %v253_v27 = vadd.f32 %v252_v26, %v251_v25  ;;  %v110_v32 = vadd.f32 %v109_v30, %v108_v28 }
  0xe9   :  { %v254_v29 = vrot.slane %v253_v27, 4  ;;  %v111_v34 = vrot.slane %v110_v32, 1 }
  0xeb   :  { %v255_v31 = vadd.f32 %v254_v29, %v253_v27  ;;  %v112_v36 = vadd.f32 %v111_v34, %v110_v32 }
  0xed   :  { %v256_v33 = vrot.slane %v255_v31, 2  ;;  %v114_v38 = vmul.f32 0.0625, %v112_v36 }
  0xef   :  { %v257_v35 = vadd.f32 %v256_v33, %v255_v31  ;;  %v115_v40 = vsub.f32 %v97_v9, %v114_v38  ;;  %v116_v41 = vsub.f32 %v100_v14, %v114_v38 }
  0xf1   :  { %v258_v37 = vrot.slane %v257_v35, 1  ;;  %v117_v43 = vmul.f32 %v115_v40, %v115_v40  ;;  %v118_v44 = vmul.f32 %v116_v41, %v116_v41 }
  0xf3   :  { %v259_v39 = vadd.f32 %v258_v37, %v257_v35  ;;  %v119_v47 = vsel %vm103_vm3, %v117_v43, 0.0  ;;  %v120_v48 = vsel %vm103_vm3, %v118_v44, 0.0 }
  0xf4   :  { %v121_v49 = vadd.f32 %v120_v48, %v119_v47 }
  0xf5   :  { %v260_v42 = vmul.f32 0.0625, %v259_v39 }
  0xf6   :  { %v122_v52 = vrot.slane %v121_v49, 4 }
  0xf7   :  { %v261_v45 = vsub.f32 %v245_v17, %v260_v42  ;;  %v262_v46 = vsub.f32 %v248_v22, %v260_v42 }
  0xf8   :  { %v123_v56 = vadd.f32 %v122_v52, %v121_v49 }
  0xf9   :  { %v263_v50 = vmul.f32 %v261_v45, %v261_v45  ;;  %v264_v51 = vmul.f32 %v262_v46, %v262_v46 }
  0xfa   :  { %v124_v58 = vrot.slane %v123_v56, 2 }
  0xfb   :  { %v265_v53 = vsel %vm103_vm3, %v263_v50, 0.0  ;;  %v266_v54 = vsel %vm103_vm3, %v264_v51, 0.0 }
  0xfc   :  { %v267_v55 = vadd.f32 %v266_v54, %v265_v53  ;;  %v125_v60 = vadd.f32 %v124_v58, %v123_v56 }
  0xfe   :  { %v268_v57 = vrot.slane %v267_v55, 4  ;;  %v126_v62 = vrot.slane %v125_v60, 1 }
 0x100   :  { %v269_v59 = vadd.f32 %v268_v57, %v267_v55  ;;  %v127_v0 = vadd.f32 %v126_v62, %v125_v60 }
 0x102   :  { %v270_v61 = vrot.slane %v269_v59, 2  ;;  %v128_v2 = vmul.f32 0.0625, %v127_v0 }
 0x104   :  { %v271_v63 = vadd.f32 %v270_v61, %v269_v59  ;;  %v129_v4 = vadd.f32 1e-05, %v128_v2 }
 0x106   :  { %v272_v1 = vrot.slane %v271_v63, 1  ;;  %375 = vrsqrt.f32 %v129_v4 }
 0x108   :  { %v273_v3 = vadd.f32 %v272_v1, %v271_v63 }
 0x10a   :  { %v274_v5 = vmul.f32 0.0625, %v273_v3 }
 0x10c   :  { %v275_v6 = vadd.f32 1e-05, %v274_v5 }
 0x10e   :  { %377 = vrsqrt.f32 %v275_v6 }
 0x110   :  { %v376_v7 = vpop.eup %375 }
 0x111   :  { %v131_v9 = vmul.f32 %v376_v7, %v115_v40  ;;  %v132_v10 = vmul.f32 %v376_v7, %v116_v41 }
 0x113   :  { %v140_v12 = vmul.f32 %v326_v8, %v131_v9  ;;  %v141_v13 = vmul.f32 %v326_v8, %v132_v10 }
 0x115   :  { %v149_v18 = vadd.f32 %v327_v11, %v140_v12  ;;  %v150_v19 = vadd.f32 %v327_v11, %v141_v13 }
 0x117   :  { %vm152_vm4 = vcmp.ge.f32.partialorder %v150_v19, 0.0  ;;  %v153_v23 = vmul.f32 0.1, %v149_v18  ;;  %v154_v24 = vmul.f32 0.1, %v150_v19  ;;  %vm151_vm5 = vcmp.ge.f32.partialorder %v149_v18, 0.0 }
 0x118   :  { %v378_v14 = vpop.eup %377 }
 0x119   :  { %v277_v16 = vmul.f32 %v378_v14, %v261_v45  ;;  %v278_v17 = vmul.f32 %v378_v14, %v262_v46  ;;  %v155_v27 = vsel %vm151_vm5, %v149_v18, %v153_v23  ;;  %v156_v29 = vsel %vm152_vm4, %v150_v19, %v154_v24 }
 0x11a   :  { %v340_v28 = vpack.c.bf16 %v155_v27, %v155_v27  ;;  %v341_v32 = vpack.c.bf16 %v156_v29, %v156_v29 }
 0x11b   :  { %v287_v21 = vmul.f32 %v336_v15, %v278_v17  ;;  %v286_v22 = vmul.f32 %v336_v15, %v277_v16 }
 0x11c   :  { %166 = vst.msk [vmem:[%s503_s10] sm:$0xf] %vm165_vm6, %v340_v28  ;;  %167 = vst.msk [vmem:[%s503_s10 + $0x4] sm:$0xf] %vm165_vm6, %v341_v32 }
 0x11d   :  { %v295_v25 = vadd.f32 %v337_v20, %v286_v22  ;;  %v296_v26 = vadd.f32 %v337_v20, %v287_v21 }
 0x11f   :  { %vm297_vm7 = vcmp.ge.f32.partialorder %v295_v25, 0.0  ;;  %v299_v30 = vmul.f32 0.1, %v295_v25  ;;  %v300_v31 = vmul.f32 0.1, %v296_v26  ;;  %vm298_vm8 = vcmp.ge.f32.partialorder %v296_v26, 0.0 }
 0x121   :  { %v301_v33 = vsel %vm297_vm7, %v295_v25, %v299_v30  ;;  %v302_v35 = vsel %vm298_vm8, %v296_v26, %v300_v31 }
 0x122   :  { %v342_v34 = vpack.c.bf16 %v301_v33, %v301_v33  ;;  %v343_v36 = vpack.c.bf16 %v302_v35, %v302_v35 }
 0x124   :  { %309 = vrot.lane.b32.xlu0 %v342_v34, %s381_s11 }
 0x128   :  { %311 = vrot.lane.b32.xlu0 %v343_v36, %s381_s11 }
 0x196   :  { %v310_v37 = vpop.permute.xlu0 %309 }
 0x197   :  { %316 = vst.msk [vmem:[%s503_s10] sm:$0xf] %vm315_vm9, %v310_v37 }
 0x19a   :  { %v312_v38 = vpop.permute.xlu0 %311 }
 0x19b   :  { %317 = vst.msk [vmem:[%s503_s10 + $0x4] sm:$0xf] %vm315_vm9, %v312_v38 }

// kernel: relation_layer_forward.3
= control target key start
LH: loop header
LB: loop body
LE: loop exit
PB: predicated region body
PF: predicated region fallthrough
CT: control target
= control target key end

     0   :  { %s2024_s29 = smov 0   ;;  %s2026_s30 = smov 0   ;;  %s2231_s0 = inlined_call_operand.vmem [shape: bf16[2,8,16], index: 0, kind: input, shape index: {}]   ;;  %s2232_s1 = inlined_call_operand.vmem [shape: bf16[16,128], index: 1, kind: input, shape index: {}]   ;;  %s2233_s2 = inlined_call_operand.vmem [shape: bf16[16,128], index: 2, kind: input, shape index: {}]   ;;  %s2234_s3 = inlined_call_operand.vmem [shape: f32[1,128], index: 3, kind: input, shape index: {}]   ;;  %s2235_s4 = inlined_call_operand.vmem [shape: bf16[128,128], index: 4, kind: input, shape index: {}]   ;;  %s2236_s5 = inlined_call_operand.vmem [shape: f32[1,128], index: 5, kind: input, shape index: {}]   ;;  %s2237_s6 = inlined_call_operand.vmem [shape: bf16[128,128], index: 6, kind: input, shape index: {}]   ;;  %s2238_s7 = inlined_call_operand.vmem [shape: f32[1,128], index: 7, kind: input, shape index: {}]   ;;  %s2239_s8 = inlined_call_operand.vmem [shape: bf16[128,128], index: 8, kind: input, shape index: {}]   ;;  %s2240_s9 = inlined_call_operand.vmem [shape: f32[1,128], index: 9, kind: input, shape index: {}]   ;;  %s2241_s10 = inlined_call_operand.vmem [shape: bf16[128,128], index: 10, kind: input, shape index: {}]   ;;  %s2242_s11 = inlined_call_operand.vmem [shape: f32[1,128], index: 11, kind: input, shape index: {}]   ;;  %s2243_s12 = inlined_call_operand.vmem [shape: bf16[128,32], index: 12, kind: input, shape index: {}]   ;;  %s2244_s13 = inlined_call_operand.vmem [shape: f32[1,32], index: 13, kind: input, shape index: {}]   ;;  %s2245_s14 = inlined_call_operand.vmem [shape: f32[2,8,32], index: 14, kind: output, shape index: {}]  }
   0x1   :  { %s2028_s15 = smov 0  }
   0x2 LB: > { %s36_s16 = sadd.s32 1, %s1940_s30  ;;  %p1616_p0 = scmp.ge.s32.totalorder %s1944_s15, 1  ;;  %s1944_s15 = sphi %s2028_s15, %s24_s15   ;;  %s1940_s30 = sphi %s2026_s30, %s2247_s30   ;;  %s1936_s29 = sphi %s2024_s29, %s2246_s29  }
   0x3   : > { %p38_p1 = scmp.ge.s32.totalorder %s36_s16, 2  ;;  %p425_p2 = scmp.lt.s32.totalorder %s1944_s15, 3 }
   0x5   : > { %s2249_s16 = smov (%p38_p1, %s36_s16), 0  ;;  %p426_p3 = pnand %p1616_p0, %p425_p2 }
   0x6   : > { %v1880_v0 = vld [vmem:[%s2232_s1] sm:$0xff] (!%p426_p3)   ;;  %v1946_v1 = vmov (!%p426_p3), 0.0   ;;  %p472_p4 = scmp.lt.s32.totalorder (!%p426_p3), %s1936_s29, 1  ;;  %vm1947_vm0 = vmmov (!%p426_p3), 0   ;;  %v1883_v3 = vld [vmem:[%s2235_s4 + $0x8] sm:$0xff] (!%p426_p3)   ;;  %vm500_vm1 = vcmask (!%p426_p3), 130048   ;;  %v597_v19 = vlaneseq (!%p426_p3) }
   0x7   : > { %429 = sbr.rel (%p426_p3) target bundleno = 1391 (0x56f), region = 76  ;;  %1729 = vmatprep.subr.bf16.mxu1 (!%p426_p3), %v1946_v1  ;;  %1731 = vmatprep.mubr.msk.bf16.mxu1 (!%p426_p3), %vm1947_vm0, %v1946_v1  ;;  %v1882_v2 = vld [vmem:[%s2235_s4] sm:$0xff] (!%p426_p3)   ;;  %v1884_v5 = vld [vmem:[%s2235_s4 + $0x10] sm:$0xff] (!%p426_p3)   ;;  %v1885_v7 = vld [vmem:[%s2235_s4 + $0x18] sm:$0xff] (!%p426_p3)   ;;  %v1948_v17 = vmov (!%p426_p3), 1966171168  }
   0x8   : > { %1730 = vmatpush3.bf16.msra.mxu1 (!%p426_p3), %v1880_v0  ;;  %v1881_v4 = vld [vmem:[%s2233_s2] sm:$0xff] (!%p426_p3)   ;;  %1741 = vmatprep.subr.bf16.mxu0 (!%p426_p3), %v1882_v2  ;;  %v1887_v9 = vld [vmem:[%s2235_s4 + $0x28] sm:$0xff] (!%p426_p3)   ;;  %v1888_v10 = vld [vmem:[%s2235_s4 + $0x30] sm:$0xff] (!%p426_p3)   ;;  %v595_v18 = vunpack.c.l.s4 (!%p426_p3), %v1948_v17  ;;  %v598_v21 = vshrl.u32 (!%p426_p3), %v597_v19, 7 }
   0x9   : > { %1735 = vmatprep.subr.bf16.mxu1 (!%p426_p3), %v1946_v1  ;;  %1742 = vmatpush3.bf16.msra.mxu0 (!%p426_p3), %v1882_v2  ;;  %v1886_v8 = vld [vmem:[%s2235_s4 + $0x20] sm:$0xff] (!%p426_p3)   ;;  %v1889_v11 = vld [vmem:[%s2235_s4 + $0x38] sm:$0xff] (!%p426_p3)   ;;  %v1891_v13 = vld [vmem:[%s2237_s6 + $0x8] sm:$0xff] (!%p426_p3)  }
   0xa   : > { %1743 = vmatprep.subr.bf16.mxu0 (!%p426_p3), %v1883_v3  ;;  %v1890_v12 = vld [vmem:[%s2237_s6] sm:$0xff] (!%p426_p3)   ;;  %v1892_v14 = vld [vmem:[%s2237_s6 + $0x10] sm:$0xff] (!%p426_p3)   ;;  %v1893_v15 = vld [vmem:[%s2237_s6 + $0x18] sm:$0xff] (!%p426_p3)   ;;  %v596_v20 = vunpack.c.0.s8 (!%p426_p3), %v595_v18  ;;  %v644_v31 = vsub.s32 (!%p426_p3), 0, %v598_v21 }
   0xb   : > { %v1894_v16 = vld [vmem:[%s2237_s6 + $0x20] sm:$0xff] (!%p426_p3)  }
   0xc   : > { %v1619_v22 = vld [vmem:[%s2234_s3] ss:$0 sm:$0xff] (!%p426_p3)  ;;  %v599_v23 = vsub.s32 (!%p426_p3), %v596_v20, %v598_v21  ;;  %v1895_v20 = vld [vmem:[%s2237_s6 + $0x28] sm:$0xff] (!%p426_p3)   ;;  %v1896_v21 = vld [vmem:[%s2237_s6 + $0x30] sm:$0xff] (!%p426_p3)  }
   0xd   : > { %1744 = vmatpush3.bf16.msra.mxu0 (!%p426_p3), %v1883_v3 }
   0xe   : > { %s2251_s29 = smov (!%p472_p4, %s1936_s29), 1  ;;  %1745 = vmatprep.subr.bf16.mxu0 %v1884_v5 }
   0xf   : > { %s1617_s23 = sshll.u32 %s2251_s29, 2  ;;  %s1618_s21 = sshll.u32 %s2251_s29, 3 }
  0x10   : > { %s475_s18 = scalar_lea.vmem %s2231_s0, %s1617_s23  ;;  %s482_s24 = scalar_lea.vmem %s2245_s14, %s1618_s21 }
  0x11   : > { %v484_v6 = vld [vmem:[%s475_s18] sm:$0xf]  ;;  %1746 = vmatpush3.bf16.msra.mxu0 %v1884_v5 }
  0x12   : > { %1732 = vmatmul.mubr.msk.bf16.vlgmr.msra.gmra.mrb[0].mxu1 %vm500_vm1, %v484_v6  ;;  %1747 = vmatprep.subr.bf16.mxu0 %v1885_v7 }
  0x13   : > { %1736 = vmatpush3.bf16.msra.mxu1 %v1881_v4  ;;  %1737 = vmatprep.mubr.msk.bf16.mxu1 %vm1947_vm0, %v1946_v1 }
  0x14   : > { %1765 = vmatprep.subr.bf16.mxu1 %v1890_v12 }
  0x15   : > { %1748 = vmatpush3.bf16.msra.mxu0 %v1885_v7 }
  0x16   : > { %1749 = vmatprep.subr.bf16.mxu0 %v1886_v8 }
  0x19   : > { %1750 = vmatpush3.bf16.msra.mxu0 %v1886_v8 }
  0x1a   : > { %1738 = vmatmul.mubr.msk.bf16.vlgmr.msra.gmra.mrb[4].mxu1 %vm500_vm1, %v484_v6  ;;  %1751 = vmatprep.subr.bf16.mxu0 %v1887_v9 }
  0x1b   : > { %1766 = vmatpush3.bf16.msra.mxu1 %v1890_v12 }
  0x1c   : > { %1767 = vmatprep.subr.bf16.mxu1 %v1891_v13 }
  0x1d   : > { %1752 = vmatpush3.bf16.msra.mxu0 %v1887_v9 }
  0x1e   : > { %1753 = vmatprep.subr.bf16.mxu0 %v1888_v10 }
  0x1f   : > { %1768 = vmatpush3.bf16.msra.mxu1 %v1891_v13 }
  0x20   : > { %1769 = vmatprep.subr.bf16.mxu1 %v1892_v14 }
  0x21   : > { %1754 = vmatpush3.bf16.msra.mxu0 %v1888_v10 }
  0x22   : > { %1755 = vmatprep.subr.bf16.mxu0 %v1889_v11 }
  0x23   : > { %1770 = vmatpush3.bf16.msra.mxu1 %v1892_v14 }
  0x24   : > { %1771 = vmatprep.subr.bf16.mxu1 %v1893_v15 }
  0x25   : > { %1756 = vmatpush3.bf16.msra.mxu0 %v1889_v11 }
  0x27   : > { %1772 = vmatpush3.bf16.msra.mxu1 %v1893_v15 }
  0x28   : > { %1773 = vmatprep.subr.bf16.mxu1 %v1894_v16 }
  0x2b   : > { %1774 = vmatpush3.bf16.msra.mxu1 %v1894_v16 }
  0x2c   : > { %1775 = vmatprep.subr.bf16.mxu1 %v1895_v20 }
  0x2f   : > { %1776 = vmatpush3.bf16.msra.mxu1 %v1895_v20 }
  0x30   : > { %1777 = vmatprep.subr.bf16.mxu1 %v1896_v21 }
  0x33   : > { %1778 = vmatpush3.bf16.msra.mxu1 %v1896_v21 }
  0xe5   : > { %v538_v24 = vpop.f32.mrb[0].mxu1 }
  0xe6   : > { %v539_v25 = vadd.f32 %v1619_v22, %v538_v24  ;;  %v1733_v26 = vpop.f32.mrb[1].mxu1  ;;  %v1897_v22 = vld [vmem:[%s2237_s6 + $0x38] sm:$0xff]   ;;  %v1899_v24 = vld [vmem:[%s2239_s8 + $0x8] sm:$0xff]  }
  0xe7   : > { %v541_v27 = vpop.f32.mrb[2].mxu1  ;;  %1779 = vmatprep.subr.bf16.mxu1 %v1897_v22  ;;  %v1901_v26 = vld [vmem:[%s2239_s8 + $0x18] sm:$0xff]  }
  0xe8   : > { %v593_v28 = vcombine.high %v539_v25, %v539_v25  ;;  %v600_v29 = vrot.slane %v539_v25, %v599_v23  ;;  %v1734_v30 = vpop.f32.mrb[3].mxu1  ;;  %1780 = vmatpush3.bf16.msra.mxu1 %v1897_v22  ;;  %v1900_v25 = vld [vmem:[%s2239_s8 + $0x10] sm:$0xff]   ;;  %v1902_v27 = vld [vmem:[%s2239_s8 + $0x20] sm:$0xff]  }
  0xe9   : > { %1813 = vmatprep.subr.bf16.mxu1 %v1946_v1 }
  0xea   : > { %v607_v32 = vrot.slane %v593_v28, %v599_v23  ;;  %v608_v33 = vcombine.high %v600_v29, %v600_v29  ;;  %v616_v34 = vrot.slane %v600_v29, %v599_v23  ;;  %v1624_v28 = vld [vmem:[%s2236_s5] ss:$0 sm:$0xff] }
  0xec   : > { %v609_v35 = vcombine.high %v607_v32, %v607_v32  ;;  %v623_v36 = vrot.slane %v607_v32, %v599_v23  ;;  %v630_v37 = vrot.slane %v608_v33, %v599_v23  ;;  %v638_v38 = vcombine.high %v616_v34, %v616_v34 }
  0xed   : > { %v645_v39 = vrot.slane %v616_v34, %v644_v31  ;;  %v586_v40 = vpop.f32.mrb[4].mxu1 }
  0xee   : > { %v637_v41 = vrot.slane %v609_v35, %v599_v23  ;;  %v639_v42 = vcombine.high %v623_v36, %v623_v36  ;;  %v640_v43 = vcombine.high %v630_v37, %v630_v37  ;;  %v653_v44 = vrot.slane %v638_v38, %v644_v31  ;;  %v1739_v45 = vpop.f32.mrb[5].mxu1  ;;  %v1898_v23 = vld [vmem:[%s2239_s8] sm:$0xff]  }
  0xef   : > { %v661_v46 = vrot.slane %v623_v36, %v644_v31  ;;  %v589_v47 = vpop.f32.mrb[6].mxu1  ;;  %v649_v48 = vrot.slane %v630_v37, %v644_v31  ;;  %v682_v49 = vadd.f32 %v645_v39, %v586_v40  ;;  %1789 = vmatprep.subr.bf16.mxu0 %v1898_v23 }
  0xf0   : > { %v641_v50 = vcombine.high %v637_v41, %v637_v41  ;;  %v657_v51 = vrot.slane %v640_v43, %v644_v31  ;;  %v665_v52 = vrot.slane %v637_v41, %v644_v31  ;;  %v669_v53 = vrot.slane %v639_v42, %v644_v31  ;;  %v1740_v54 = vpop.f32.mrb[7].mxu1 }
  0xf1   : > { %v683_v55 = vadd.f32 %v649_v48, %v586_v40  ;;  %vm690_vm2 = vcmp.ge.f32.partialorder %v682_v49, 0.0  ;;  %v698_v56 = vmul.f32 0.1, %v682_v49  ;;  %v684_v57 = vadd.f32 %v653_v44, %v586_v40 }
  0xf2   : > { %v685_v58 = vadd.f32 %v657_v51, %v586_v40  ;;  %v686_v59 = vadd.f32 %v661_v46, %v586_v40  ;;  %v687_v60 = vadd.f32 %v665_v52, %v586_v40  ;;  %v673_v61 = vrot.slane %v641_v50, %v644_v31 }
  0xf3   : > { %vm691_vm3 = vcmp.ge.f32.partialorder %v683_v55, 0.0  ;;  %v699_v62 = vmul.f32 0.1, %v683_v55  ;;  %v706_v63 = vsel %vm690_vm2, %v682_v49, %v698_v56  ;;  %vm692_vm4 = vcmp.ge.f32.partialorder %v684_v57, 0.0 }
  0xf4   : > { %vm693_vm5 = vcmp.ge.f32.partialorder %v685_v58, 0.0  ;;  %v700_v0 = vmul.f32 0.1, %v684_v57  ;;  %v701_v2 = vmul.f32 0.1, %v685_v58  ;;  %vm694_vm6 = vcmp.ge.f32.partialorder %v686_v59, 0.0 }
  0xf5   : > { %v707_v3 = vsel %vm691_vm3, %v683_v55, %v699_v62  ;;  %vm695_vm7 = vcmp.ge.f32.partialorder %v687_v60, 0.0  ;;  %v702_v4 = vmul.f32 0.1, %v686_v59  ;;  %v703_v5 = vmul.f32 0.1, %v687_v60 }
  0xf6   : > { %v714_v6 = vpack.c.bf16 %v707_v3, %v706_v63  ;;  %v708_v7 = vsel %vm692_vm4, %v684_v57, %v700_v0  ;;  %v709_v8 = vsel %vm693_vm5, %v685_v58, %v701_v2  ;;  %v688_v9 = vadd.f32 %v669_v53, %v586_v40  ;;  %v1903_v2 = vld [vmem:[%s2239_s8 + $0x28] sm:$0xff]   ;;  %v1904_v3 = vld [vmem:[%s2239_s8 + $0x30] sm:$0xff]  }
  0xf7   : > { %v715_v10 = vpack.c.bf16 %v709_v8, %v708_v7  ;;  %v710_v11 = vsel %vm694_vm6, %v686_v59, %v702_v4  ;;  %v711_v12 = vsel %vm695_vm7, %v687_v60, %v703_v5  ;;  %v689_v13 = vadd.f32 %v673_v61, %v586_v40  ;;  %v1905_v4 = vld [vmem:[%s2239_s8 + $0x38] sm:$0xff]   ;;  %v1633_v5 = vld [vmem:[%s2238_s7] ss:$0 sm:$0xff] }
  0xf8   : > { %1757 = vmatprep.mubr.bf16.mxu0 %v714_v6  ;;  %v716_v14 = vpack.c.bf16 %v711_v12, %v710_v11  ;;  %vm696_vm8 = vcmp.ge.f32.partialorder %v688_v9, 0.0  ;;  %v704_v15 = vmul.f32 0.1, %v688_v9 }
  0xf9   : > { %1758 = vmatmul.mubr.bf16.vlgmr.msra.gmra.mrb[0].mxu0 %v715_v10  ;;  %vm697_vm9 = vcmp.ge.f32.partialorder %v689_v13, 0.0  ;;  %v705_v16 = vmul.f32 0.1, %v689_v13 }
  0xfa   : > { %1761 = vmatprep.mubr.bf16.mxu0 %v716_v14  ;;  %v712_v17 = vsel %vm696_vm8, %v688_v9, %v704_v15  ;;  %1790 = vmatpush3.bf16.msra.mxu0 %v1898_v23 }
  0xfb   : > { %v713_v18 = vsel %vm697_vm9, %v689_v13, %v705_v16  ;;  %1791 = vmatprep.subr.bf16.mxu0 %v1899_v24 }
  0xfc   : > { %v717_v19 = vpack.c.bf16 %v713_v18, %v712_v17 }
  0xfe   : > { %1792 = vmatpush3.bf16.msra.mxu0 %v1899_v24 }
  0xff   : > { %1793 = vmatprep.subr.bf16.mxu0 %v1900_v25 }
 0x101   : > { %1762 = vmatmul.mubr.bf16.gmra.mrb[4].mxu0 %v717_v19 }
 0x102   : > { %1794 = vmatpush3.bf16.msra.mxu0 %v1900_v25 }
 0x103   : > { %1795 = vmatprep.subr.bf16.mxu0 %v1901_v26 }
 0x106   : > { %1796 = vmatpush3.bf16.msra.mxu0 %v1901_v26 }
 0x107   : > { %1797 = vmatprep.subr.bf16.mxu0 %v1902_v27 }
 0x10a   : > { %1798 = vmatpush3.bf16.msra.mxu0 %v1902_v27 }
 0x10b   : > { %1799 = vmatprep.subr.bf16.mxu0 %v1903_v2 }
 0x10e   : > { %1800 = vmatpush3.bf16.msra.mxu0 %v1903_v2 }
 0x10f   : > { %1801 = vmatprep.subr.bf16.mxu0 %v1904_v3 }
 0x112   : > { %1802 = vmatpush3.bf16.msra.mxu0 %v1904_v3 }
 0x113   : > { %1803 = vmatprep.subr.bf16.mxu0 %v1905_v4 }
 0x116   : > { %1804 = vmatpush3.bf16.msra.mxu0 %v1905_v4 }
 0x117   : > { %1833 = vmatprep.subr.bf16.mxu0 %v1946_v1 }
 0x1cc   : > { %v1759_v29 = vpop.f32.mrb[0].mxu0 }
 0x1cd   : > { %v832_v30 = vadd.f32 %v1759_v29, %v1624_v28  ;;  %v823_v31 = vpop.f32.mrb[1].mxu0 }
 0x1ce   : > { %v824_v32 = vadd.f32 %v1624_v28, %v823_v31  ;;  %v1760_v33 = vpop.f32.mrb[2].mxu0 }
 0x1cf   : > { %v864_v34 = vmul.f32 0.1, %v832_v30  ;;  %v835_v35 = vadd.f32 %v1760_v33, %v1624_v28  ;;  %v826_v36 = vpop.f32.mrb[3].mxu0  ;;  %vm856_vm10 = vcmp.ge.f32.partialorder %v832_v30, 0.0 }
 0x1d0   : > { %v862_v37 = vmul.f32 0.1, %v824_v32  ;;  %v827_v38 = vadd.f32 %v1624_v28, %v826_v36  ;;  %vm854_vm11 = vcmp.ge.f32.partialorder %v824_v32, 0.0 }
 0x1d1   : > { %vm857_vm12 = vcmp.ge.f32.partialorder %v835_v35, 0.0  ;;  %v865_v39 = vmul.f32 0.1, %v835_v35  ;;  %v872_v41 = vsel %vm856_vm10, %v832_v30, %v864_v34 }
 0x1d2   : > { %vm855_vm13 = vcmp.ge.f32.partialorder %v827_v38, 0.0  ;;  %v863_v40 = vmul.f32 0.1, %v827_v38  ;;  %v870_v45 = vsel %vm854_vm11, %v824_v32, %v862_v37 }
 0x1d3   : > { %v873_v42 = vsel %vm857_vm12, %v835_v35, %v865_v39 }
 0x1d4   : > { %v879_v43 = vpack.c.bf16 %v873_v42, %v872_v41  ;;  %v1763_v44 = vpop.f32.mrb[4].mxu0  ;;  %v871_v46 = vsel %vm855_vm13, %v827_v38, %v863_v40  ;;  %v1906_v42 = vld [vmem:[%s2241_s10] sm:$0xff]  }
 0x1d5   : > { %v848_v47 = vadd.f32 %v1763_v44, %v1624_v28  ;;  %v839_v48 = vpop.f32.mrb[5].mxu0  ;;  %v878_v49 = vpack.c.bf16 %v871_v46, %v870_v45  ;;  %v1908_v44 = vld [vmem:[%s2241_s10 + $0x10] sm:$0xff]   ;;  %v1909_v45 = vld [vmem:[%s2241_s10 + $0x18] sm:$0xff]   ;;  %v1910_v46 = vld [vmem:[%s2241_s10 + $0x20] sm:$0xff]  }
 0x1d6   : > { %v840_v50 = vadd.f32 %v1624_v28, %v839_v48  ;;  %v1764_v51 = vpop.f32.mrb[6].mxu0  ;;  %v1912_v48 = vld [vmem:[%s2241_s10 + $0x30] sm:$0xff]  }
 0x1d7   : > { %v868_v52 = vmul.f32 0.1, %v848_v47  ;;  %v851_v53 = vadd.f32 %v1764_v51, %v1624_v28  ;;  %v842_v54 = vpop.f32.mrb[7].mxu0  ;;  %1781 = vmatprep.mubr.bf16.mxu1 %v878_v49  ;;  %vm860_vm14 = vcmp.ge.f32.partialorder %v848_v47, 0.0  ;;  %v1913_v49 = vld [vmem:[%s2241_s10 + $0x38] sm:$0xff]   ;;  %v1915_v51 = vld [vmem:[%s2243_s12 + $0x8] sm:$0xff]  }
 0x1d8   : > { %v866_v55 = vmul.f32 0.1, %v840_v50  ;;  %v843_v56 = vadd.f32 %v1624_v28, %v842_v54  ;;  %1782 = vmatmul.mubr.bf16.vlgmr.msra.gmra.mrb[8].mxu1 %v879_v43  ;;  %vm858_vm15 = vcmp.ge.f32.partialorder %v840_v50, 0.0  ;;  %v1907_v43 = vld [vmem:[%s2241_s10 + $0x8] sm:$0xff]   ;;  %v1918_v54 = vld [vmem:[%s2243_s12 + $0x20] sm:$0xff]  }
 0x1d9   : > { %vm861_vm1 = vcmp.ge.f32.partialorder %v851_v53, 0.0  ;;  %v869_v57 = vmul.f32 0.1, %v851_v53  ;;  %v876_v59 = vsel %vm860_vm14, %v848_v47, %v868_v52  ;;  %1814 = vmatpush3.bf16.msra.mxu1 %v1906_v42  ;;  %v1911_v47 = vld [vmem:[%s2241_s10 + $0x28] sm:$0xff]   ;;  %v1916_v52 = vld [vmem:[%s2243_s12 + $0x10] sm:$0xff]  }
 0x1da   : > { %vm859_vm2 = vcmp.ge.f32.partialorder %v843_v56, 0.0  ;;  %v867_v58 = vmul.f32 0.1, %v843_v56  ;;  %v874_v61 = vsel %vm858_vm15, %v840_v50, %v866_v55  ;;  %1815 = vmatprep.subr.bf16.mxu1 %v1946_v1  ;;  %v1914_v50 = vld [vmem:[%s2243_s12] sm:$0xff]   ;;  %v1919_v55 = vld [vmem:[%s2243_s12 + $0x28] sm:$0xff]  }
 0x1db   : > { %v877_v60 = vsel %vm861_vm1, %v851_v53, %v869_v57  ;;  %v1917_v53 = vld [vmem:[%s2243_s12 + $0x18] sm:$0xff]  }
 0x1dc   : > { %v875_v62 = vsel %vm859_vm2, %v843_v56, %v867_v58  ;;  %v881_v63 = vpack.c.bf16 %v877_v60, %v876_v59  ;;  %v1642_v56 = vld [vmem:[%s2240_s9] ss:$0 sm:$0xff] }
 0x1dd   : > { %v880_v0 = vpack.c.bf16 %v875_v62, %v874_v61  ;;  %1816 = vmatpush3.bf16.msra.mxu1 %v1907_v43 }
 0x1de   : > { %1817 = vmatprep.subr.bf16.mxu1 %v1946_v1 }
 0x1df   : > { %1785 = vmatprep.mubr.bf16.mxu1 %v880_v0 }
 0x1e0   : > { %1786 = vmatmul.mubr.bf16.gmra.mrb[12].mxu1 %v881_v63 }
 0x1e1   : > { %1829 = vmatprep.mubr.msk.bf16.mxu1 %vm1947_vm0, %v1946_v1  ;;  %1818 = vmatpush3.bf16.msra.mxu1 %v1908_v44 }
 0x1e2   : > { %1819 = vmatprep.subr.bf16.mxu1 %v1946_v1 }
 0x1e5   : > { %1820 = vmatpush3.bf16.msra.mxu1 %v1909_v45 }
 0x1e6   : > { %1821 = vmatprep.subr.bf16.mxu1 %v1946_v1 }
 0x1e9   : > { %1822 = vmatpush3.bf16.msra.mxu1 %v1910_v46 }
 0x1ea   : > { %1823 = vmatprep.subr.bf16.mxu1 %v1946_v1 }
 0x1ed   : > { %1824 = vmatpush3.bf16.msra.mxu1 %v1911_v47 }
 0x1ee   : > { %1825 = vmatprep.subr.bf16.mxu1 %v1946_v1 }
 0x1f1   : > { %1826 = vmatpush3.bf16.msra.mxu1 %v1912_v48 }
 0x1f2   : > { %1827 = vmatprep.subr.bf16.mxu1 %v1946_v1 }
 0x1f5   : > { %1828 = vmatpush3.bf16.msra.mxu1 %v1913_v49 }
 0x2ab   : > { %v1783_v6 = vpop.f32.mrb[8].mxu1 }
 0x2ac   : > { %v996_v7 = vadd.f32 %v1783_v6, %v1633_v5  ;;  %v987_v8 = vpop.f32.mrb[9].mxu1 }
 0x2ad   : > { %v988_v9 = vadd.f32 %v1633_v5, %v987_v8  ;;  %v1784_v10 = vpop.f32.mrb[10].mxu1 }
 0x2ae   : > { %v1028_v11 = vmul.f32 0.1, %v996_v7  ;;  %v999_v12 = vadd.f32 %v1784_v10, %v1633_v5  ;;  %v990_v13 = vpop.f32.mrb[11].mxu1  ;;  %vm1020_vm3 = vcmp.ge.f32.partialorder %v996_v7, 0.0 }
 0x2af   : > { %v1026_v14 = vmul.f32 0.1, %v988_v9  ;;  %v991_v15 = vadd.f32 %v1633_v5, %v990_v13  ;;  %vm1018_vm4 = vcmp.ge.f32.partialorder %v988_v9, 0.0 }
 0x2b0   : > { %vm1021_vm5 = vcmp.ge.f32.partialorder %v999_v12, 0.0  ;;  %v1029_v16 = vmul.f32 0.1, %v999_v12  ;;  %v1036_v18 = vsel %vm1020_vm3, %v996_v7, %v1028_v11  ;;  %vm1317_vm3 = vcmask 1041409  }
 0x2b1   : > { %vm1019_vm6 = vcmp.ge.f32.partialorder %v991_v15, 0.0  ;;  %v1027_v17 = vmul.f32 0.1, %v991_v15  ;;  %v1034_v22 = vsel %vm1018_vm4, %v988_v9, %v1026_v14  ;;  %vm1319_vm4 = vcmask 1042434  }
 0x2b2   : > { %v1037_v19 = vsel %vm1021_vm5, %v999_v12, %v1029_v16  ;;  %vm1321_vm5 = vcmask 1043459  }
 0x2b3   : > { %v1043_v20 = vpack.c.bf16 %v1037_v19, %v1036_v18  ;;  %v1787_v21 = vpop.f32.mrb[12].mxu1  ;;  %v1035_v23 = vsel %vm1019_vm6, %v991_v15, %v1027_v17  ;;  %vm1323_vm6 = vcmask 1044484  }
 0x2b4   : > { %v1012_v24 = vadd.f32 %v1787_v21, %v1633_v5  ;;  %v1003_v25 = vpop.f32.mrb[13].mxu1  ;;  %v1042_v26 = vpack.c.bf16 %v1035_v23, %v1034_v22 }
 0x2b5   : > { %v1004_v27 = vadd.f32 %v1633_v5, %v1003_v25  ;;  %v1788_v28 = vpop.f32.mrb[14].mxu1 }
 0x2b6   : > { %v1032_v29 = vmul.f32 0.1, %v1012_v24  ;;  %v1015_v30 = vadd.f32 %v1788_v28, %v1633_v5  ;;  %v1006_v31 = vpop.f32.mrb[15].mxu1  ;;  %1805 = vmatprep.mubr.bf16.mxu0 %v1042_v26  ;;  %vm1024_vm7 = vcmp.ge.f32.partialorder %v1012_v24, 0.0 }
 0x2b7   : > { %v1030_v32 = vmul.f32 0.1, %v1004_v27  ;;  %v1007_v33 = vadd.f32 %v1633_v5, %v1006_v31  ;;  %1806 = vmatmul.mubr.bf16.vlgmr.msra.gmra.mrb[8].mxu0 %v1043_v20  ;;  %vm1022_vm8 = vcmp.ge.f32.partialorder %v1004_v27, 0.0 }
 0x2b8   : > { %vm1025_vm9 = vcmp.ge.f32.partialorder %v1015_v30, 0.0  ;;  %v1033_v34 = vmul.f32 0.1, %v1015_v30  ;;  %v1040_v36 = vsel %vm1024_vm7, %v1012_v24, %v1032_v29  ;;  %1834 = vmatpush3.bf16.msra.mxu0 %v1914_v50  ;;  %vm1325_vm7 = vcmask 1045509  }
 0x2b9   : > { %vm1023_vm10 = vcmp.ge.f32.partialorder %v1007_v33, 0.0  ;;  %v1031_v35 = vmul.f32 0.1, %v1007_v33  ;;  %v1038_v38 = vsel %vm1022_vm8, %v1004_v27, %v1030_v32  ;;  %1835 = vmatprep.subr.bf16.mxu0 %v1946_v1  ;;  %vm1327_vm8 = vcmask 1046534  }
 0x2ba   : > { %v1041_v37 = vsel %vm1025_vm9, %v1015_v30, %v1033_v34  ;;  %vm1329_vm9 = vcmask 1047559  }
 0x2bb   : > { %v1039_v39 = vsel %vm1023_vm10, %v1007_v33, %v1031_v35  ;;  %v1045_v40 = vpack.c.bf16 %v1041_v37, %v1040_v36 }
 0x2bc   : > { %v1044_v41 = vpack.c.bf16 %v1039_v39, %v1038_v38  ;;  %1836 = vmatpush3.bf16.msra.mxu0 %v1915_v51 }
 0x2bd   : > { %1837 = vmatprep.subr.bf16.mxu0 %v1946_v1 }
 0x2be   : > { %1809 = vmatprep.mubr.bf16.mxu0 %v1044_v41 }
 0x2bf   : > { %1810 = vmatmul.mubr.bf16.gmra.mrb[12].mxu0 %v1045_v40 }
 0x2c0   : > { %1849 = vmatprep.mubr.msk.bf16.mxu0 %vm1947_vm0, %v1946_v1  ;;  %1838 = vmatpush3.bf16.msra.mxu0 %v1916_v52 }
 0x2c1   : > { %1839 = vmatprep.subr.bf16.mxu0 %v1946_v1 }
 0x2c4   : > { %1840 = vmatpush3.bf16.msra.mxu0 %v1917_v53 }
 0x2c5   : > { %1841 = vmatprep.subr.bf16.mxu0 %v1946_v1 }
 0x2c8   : > { %1842 = vmatpush3.bf16.msra.mxu0 %v1918_v54 }
 0x2c9   : > { %1843 = vmatprep.subr.bf16.mxu0 %v1946_v1 }
 0x2cc   : > { %1844 = vmatpush3.bf16.msra.mxu0 %v1919_v55 }
 0x2cd   : > { %1845 = vmatprep.subr.bf16.mxu0 %v1946_v1 }
 0x38a   : > { %v1807_v57 = vpop.f32.mrb[8].mxu0 }
 0x38b   : > { %v1160_v58 = vadd.f32 %v1807_v57, %v1642_v56  ;;  %v1151_v59 = vpop.f32.mrb[9].mxu0 }
 0x38c   : > { %v1152_v60 = vadd.f32 %v1642_v56, %v1151_v59  ;;  %v1808_v61 = vpop.f32.mrb[10].mxu0 }
 0x38d   : > { %vm1184_vm0 = vcmp.ge.f32.partialorder %v1160_v58, 0.0  ;;  %v1192_v62 = vmul.f32 0.1, %v1160_v58  ;;  %v1163_v63 = vadd.f32 %v1808_v61, %v1642_v56  ;;  %v1154_v0 = vpop.f32.mrb[11].mxu0 }
 0x38e   : > { %vm1182_vm11 = vcmp.ge.f32.partialorder %v1152_v60, 0.0  ;;  %v1190_v2 = vmul.f32 0.1, %v1152_v60  ;;  %v1155_v3 = vadd.f32 %v1642_v56, %v1154_v0 }
 0x38f   : > { %v1200_v4 = vsel %vm1184_vm0, %v1160_v58, %v1192_v62  ;;  %vm1185_vm12 = vcmp.ge.f32.partialorder %v1163_v63, 0.0  ;;  %v1193_v5 = vmul.f32 0.1, %v1163_v63 }
 0x390   : > { %v1218_v6 = vrot.slane %v1200_v4, 4  ;;  %v1198_v7 = vsel %vm1182_vm11, %v1152_v60, %v1190_v2  ;;  %vm1183_vm13 = vcmp.ge.f32.partialorder %v1155_v3, 0.0  ;;  %v1191_v8 = vmul.f32 0.1, %v1155_v3 }
 0x391   : > { %v1206_v9 = vrot.slane %v1198_v7, 4  ;;  %v1201_v10 = vsel %vm1185_vm12, %v1163_v63, %v1193_v5  ;;  %vm1539_vm11 = vcmask 261120  }
 0x392   : > { %v1219_v11 = vadd.f32 %v1218_v6, %v1200_v4  ;;  %v1224_v12 = vrot.slane %v1201_v10, 4  ;;  %v1199_v13 = vsel %vm1183_vm13, %v1155_v3, %v1191_v8  ;;  %v1811_v14 = vpop.f32.mrb[12].mxu0 }
 0x393   : > { %v1207_v15 = vadd.f32 %v1206_v9, %v1198_v7  ;;  %v1212_v16 = vrot.slane %v1199_v13, 4  ;;  %v1176_v17 = vadd.f32 %v1811_v14, %v1642_v56  ;;  %v1167_v18 = vpop.f32.mrb[13].mxu0 }
 0x394   : > { %v1220_v19 = vrot.slane %v1219_v11, 2  ;;  %v1225_v20 = vadd.f32 %v1224_v12, %v1201_v10  ;;  %v1168_v21 = vadd.f32 %v1642_v56, %v1167_v18  ;;  %v1812_v22 = vpop.f32.mrb[14].mxu0 }
 0x395   : > { %v1208_v23 = vrot.slane %v1207_v15, 2  ;;  %v1213_v24 = vadd.f32 %v1212_v16, %v1199_v13  ;;  %vm1188_vm14 = vcmp.ge.f32.partialorder %v1176_v17, 0.0  ;;  %v1196_v25 = vmul.f32 0.1, %v1176_v17  ;;  %v1170_v26 = vpop.f32.mrb[15].mxu0 }
 0x396   : > { %v1221_v27 = vadd.f32 %v1220_v19, %v1219_v11  ;;  %v1226_v28 = vrot.slane %v1225_v20, 2  ;;  %vm1186_vm15 = vcmp.ge.f32.partialorder %v1168_v21, 0.0  ;;  %v1194_v29 = vmul.f32 0.1, %v1168_v21 }
 0x397   : > { %v1209_v30 = vadd.f32 %v1208_v23, %v1207_v15  ;;  %v1214_v31 = vrot.slane %v1213_v24, 2  ;;  %v1204_v32 = vsel %vm1188_vm14, %v1176_v17, %v1196_v25  ;;  %v1179_v33 = vadd.f32 %v1812_v22, %v1642_v56 }
 0x398   : > { %v1222_v34 = vrot.slane %v1221_v27, 1  ;;  %v1227_v35 = vadd.f32 %v1226_v28, %v1225_v20  ;;  %v1242_v36 = vrot.slane %v1204_v32, 4  ;;  %v1202_v37 = vsel %vm1186_vm15, %v1168_v21, %v1194_v29 }
 0x399   : > { %v1210_v38 = vrot.slane %v1209_v30, 1  ;;  %v1215_v39 = vadd.f32 %v1214_v31, %v1213_v24  ;;  %v1230_v40 = vrot.slane %v1202_v37, 4  ;;  %vm1189_vm1 = vcmp.ge.f32.partialorder %v1179_v33, 0.0 }
 0x39a   : > { %v1223_v41 = vadd.f32 %v1222_v34, %v1221_v27  ;;  %v1228_v42 = vrot.slane %v1227_v35, 1  ;;  %v1243_v43 = vadd.f32 %v1242_v36, %v1204_v32  ;;  %v1197_v44 = vmul.f32 0.1, %v1179_v33 }
 0x39b   : > { %v1211_v45 = vadd.f32 %v1210_v38, %v1209_v30  ;;  %v1216_v46 = vrot.slane %v1215_v39, 1  ;;  %v1231_v47 = vadd.f32 %v1230_v40, %v1202_v37  ;;  %v1171_v48 = vadd.f32 %v1642_v56, %v1170_v26 }
 0x39c   : > { %v1264_v49 = vmul.f32 0.125, %v1223_v41  ;;  %v1229_v50 = vadd.f32 %v1228_v42, %v1227_v35  ;;  %v1244_v51 = vrot.slane %v1243_v43, 2  ;;  %v1205_v52 = vsel %vm1189_vm1, %v1179_v33, %v1197_v44  ;;  %v1921_v44 = vld [vmem:[%s2243_s12 + $0x38] sm:$0xff]  }
 0x39d   : > { %v1262_v53 = vmul.f32 0.125, %v1211_v45  ;;  %v1217_v54 = vadd.f32 %v1216_v46, %v1215_v39  ;;  %v1232_v55 = vrot.slane %v1231_v47, 2  ;;  %v1248_v57 = vrot.slane %v1205_v52, 4  ;;  %v1651_v45 = vld [vmem:[%s2242_s11] ss:$0 sm:$0xff] }
 0x39e   : > { %v1265_v58 = vmul.f32 0.125, %v1229_v50  ;;  %vm1187_vm2 = vcmp.ge.f32.partialorder %v1171_v48, 0.0  ;;  %v1272_v63 = vpack.c.bf16 %v1264_v49, %v1264_v49  ;;  %v1245_v2 = vadd.f32 %v1244_v51, %v1243_v43  ;;  %v1920_v43 = vld [vmem:[%s2243_s12 + $0x30] sm:$0xff]  }
 0x39f   : > { %v1270_v59 = vpack.c.bf16 %v1262_v53, %v1262_v53  ;;  %v1263_v60 = vmul.f32 0.125, %v1217_v54  ;;  %v1233_v61 = vadd.f32 %v1232_v55, %v1231_v47  ;;  %v1249_v62 = vadd.f32 %v1248_v57, %v1205_v52  ;;  %1846 = vmatpush3.bf16.msra.mxu0 %v1920_v43 }
 0x3a0   : > { %v1273_v0 = vpack.c.bf16 %v1265_v58, %v1265_v58  ;;  %v1195_v3 = vmul.f32 0.1, %v1171_v48  ;;  %v1311_v12 = vunpack.c.l.b16 %v1272_v63  ;;  %v1246_v14 = vrot.slane %v1245_v2, 1  ;;  %1847 = vmatprep.subr.bf16.mxu0 %v1946_v1  ;;  %v1660_v1 = vld [vmem:[%s2244_s13] ss:$0 sm:$0xff] }
 0x3a1   : > { %v1271_v4 = vpack.c.bf16 %v1263_v60, %v1263_v60  ;;  %v1234_v56 = vrot.slane %v1233_v61, 1  ;;  %v1250_v5 = vrot.slane %v1249_v62, 2  ;;  %v1309_v6 = vunpack.c.l.b16 %v1270_v59 }
 0x3a2   : > { %v1203_v7 = vsel %vm1187_vm2, %v1171_v48, %v1195_v3  ;;  %v1312_v13 = vunpack.c.l.b16 %v1273_v0  ;;  %v1247_v23 = vadd.f32 %v1246_v14, %v1245_v2 }
 0x3a3   : > { %v1310_v8 = vunpack.c.l.b16 %v1271_v4  ;;  %v1235_v9 = vadd.f32 %v1234_v56, %v1233_v61  ;;  %v1251_v10 = vadd.f32 %v1250_v5, %v1249_v62  ;;  %v1236_v11 = vrot.slane %v1203_v7, 4  ;;  %1848 = vmatpush3.bf16.msra.mxu0 %v1921_v44 }
 0x3a4   : > { %v1268_v29 = vmul.f32 0.125, %v1247_v23 }
 0x3a5   : > { %v1318_v15 = vsel %vm1317_vm3, %v1310_v8, %v1309_v6  ;;  %v1266_v16 = vmul.f32 0.125, %v1235_v9  ;;  %v1252_v17 = vrot.slane %v1251_v10, 1  ;;  %v1237_v18 = vadd.f32 %v1236_v11, %v1203_v7 }
 0x3a6   : > { %v1320_v19 = vsel %vm1319_vm4, %v1311_v12, %v1318_v15  ;;  %v1276_v33 = vpack.c.bf16 %v1268_v29, %v1268_v29 }
 0x3a7   : > { %v1274_v20 = vpack.c.bf16 %v1266_v16, %v1266_v16  ;;  %v1322_v21 = vsel %vm1321_vm5, %v1312_v13, %v1320_v19  ;;  %v1238_v22 = vrot.slane %v1237_v18, 2  ;;  %v1253_v25 = vadd.f32 %v1252_v17, %v1251_v10 }
 0x3a8   : > { %v1315_v37 = vunpack.c.l.b16 %v1276_v33 }
 0x3a9   : > { %v1313_v24 = vunpack.c.l.b16 %v1274_v20  ;;  %v1239_v26 = vadd.f32 %v1238_v22, %v1237_v18  ;;  %v1269_v30 = vmul.f32 0.125, %v1253_v25 }
 0x3ab   : > { %v1324_v27 = vsel %vm1323_vm6, %v1313_v24, %v1322_v21  ;;  %v1240_v28 = vrot.slane %v1239_v26, 1  ;;  %v1277_v34 = vpack.c.bf16 %v1269_v30, %v1269_v30 }
 0x3ad   : > { %v1241_v31 = vadd.f32 %v1240_v28, %v1239_v26  ;;  %v1316_v38 = vunpack.c.l.b16 %v1277_v34 }
 0x3af   : > { %v1267_v32 = vmul.f32 0.125, %v1241_v31 }
 0x3b1   : > { %v1275_v35 = vpack.c.bf16 %v1267_v32, %v1267_v32 }
 0x3b3   : > { %v1314_v36 = vunpack.c.l.b16 %v1275_v35 }
 0x3b5   : > { %v1326_v39 = vsel %vm1325_vm7, %v1314_v36, %v1324_v27 }
 0x3b6   : > { %v1328_v40 = vsel %vm1327_vm8, %v1315_v37, %v1326_v39 }
 0x3b7   : > { %v1330_v41 = vsel %vm1329_vm9, %v1316_v38, %v1328_v40 }
 0x3b8   : > { %v1331_v42 = vpack.c.b16 %v1330_v41, %v1330_v41 }
 0x3ba   : > { %1830 = vmatmul.mubr.bf16.vlgmr.msra.gmra.mrb[16].mxu1 %v1331_v42 }
 0x48d   : > { %v1415_v46 = vpop.f32.mrb[16].mxu1 }
 0x48e   : > { %v1416_v47 = vadd.f32 %v1651_v45, %v1415_v46  ;;  %v1831_v48 = vpop.f32.mrb[17].mxu1 }
 0x48f   : > { %v1418_v49 = vpop.f32.mrb[18].mxu1 }
 0x490   : > { %vm1421_vm10 = vcmp.ge.f32.partialorder %v1416_v47, 0.0  ;;  %v1422_v50 = vmul.f32 0.1, %v1416_v47  ;;  %v1832_v51 = vpop.f32.mrb[19].mxu1 }
 0x492   : > { %v1423_v52 = vsel %vm1421_vm10, %v1416_v47, %v1422_v50 }
 0x493   : > { %v1424_v53 = vpack.c.bf16 %v1423_v52, %v1423_v52 }
 0x495   : > { %1850 = vmatmul.mubr.bf16.vlgmr.msra.gmra.mrb[16].mxu0 %v1424_v53 }
 0x568   : > { %v1530_v54 = vpop.f32.mrb[16].mxu0 }
 0x569   : > { %v1531_v55 = vadd.f32 %v1660_v1, %v1530_v54  ;;  %v1851_v57 = vpop.f32.mrb[17].mxu0 }
 0x56a   : > { %v1533_v58 = vpop.f32.mrb[18].mxu0 }
 0x56b   : > { %vm1536_vm0 = vcmp.ge.f32.partialorder %v1531_v55, 0.0  ;;  %v1537_v59 = vmul.f32 0.1, %v1531_v55  ;;  %v1852_v60 = vpop.f32.mrb[19].mxu0 }
 0x56d   : > { %v1538_v61 = vsel %vm1536_vm0, %v1531_v55, %v1537_v59 }
 0x56e   : > { %1540 = vst.msk [vmem:[%s482_s24] sm:$0xff] %vm1539_vm11, %v1538_v61 }
 0x56f PF: > { %s24_s15 = sadd.s32 1, %s1944_s15   ;;  %s2246_s29 = smov %s1940_s30 }
 0x570   : > { %p21_p5 = scmp.ge.s32.totalorder %s24_s15, 4   ;;  %s2247_s30 = smov %s2249_s16 }
 0x572   :  { %23 = sbr.rel (!%p21_p5) target bundleno = 2 (0x2), region = 106 }

</bundles_post_ra>
